<compile_context>
chip_gen: v7x
topology: tpu7x:2x2x1
jax: 0.10.0
libtpu: 0.0.40
codegen_flags: <defaults>
</compile_context>

<pallas_src>
import functools

import jax
import jax.numpy as jnp
import numpy as np
from jax.experimental import pallas as pl
from jax.experimental.pallas import tpu as pltpu


# --------------------------------------------------------------------------
# Hardware queries / feature probes
# --------------------------------------------------------------------------
def _tpu_generation():
    try:
        kind = jax.devices()[0].device_kind.lower()
    except Exception:  # hardware query only; fall back to conservative default
        return None
    if "v7" in kind or "7x" in kind:
        return 7
    if "v6" in kind:
        return 6
    if "v5" in kind:
        return 5
    if "v4" in kind:
        return 4
    return None


def _vmem_capacity_bytes(gen):
    try:
        cap = getattr(pltpu.get_tpu_info(), "vmem_capacity_bytes", None)
        if cap:
            return int(cap)
    except Exception:  # feature probe only; use per-generation fallback
        pass
    return (64 << 20) if gen == 7 else (128 << 20)


@functools.lru_cache(maxsize=1)
def _single_buffer_supported():
    """One-time probe of pl.Buffered(1) on a trivial dummy kernel.

    The probe (and only the probe) catches exceptions, so errors from the real
    MultiDAE kernels are never swallowed.
    """
    if not hasattr(pl, "Buffered"):
        return False

    def _copy_kernel(a_ref, o_ref):
        o_ref[...] = a_ref[...]

    try:
        probe = pl.pallas_call(
            _copy_kernel,
            grid=(2,),
            in_specs=[pl.BlockSpec((8, 128), lambda i: (0, 0),
                                   pipeline_mode=pl.Buffered(1))],
            out_specs=pl.BlockSpec((8, 128), lambda i: (i, 0)),
            out_shape=jax.ShapeDtypeStruct((16, 128), jnp.float32),
        )
        a = jnp.arange(8 * 128, dtype=jnp.float32).reshape(8, 128)
        out = jax.block_until_ready(probe(a))
        return bool(jnp.allclose(out[:8], a)) and bool(jnp.allclose(out[8:], a))
    except Exception:
        return False


def _single_buffer_kwargs():
    # Constant-index (weight/bias) blocks gain nothing from double buffering;
    # single-buffer them when this jax version supports it.
    if _single_buffer_supported():
        return {"pipeline_mode": pl.Buffered(1)}
    return {}


def _pick_tb(batch, gen):
    """Batch tile: 256 rows on v6e/v7x (2x256^2 MXU), 128 on v5e (4x128^2)."""
    pref = 256 if gen in (6, 7) else 128
    cands = [c for c in (256, 128, 64, 32, 16, 8) if c <= pref and batch % c == 0]
    if not cands:
        return batch
    if gen == 7:
        # keep >= 2 grid steps so the "parallel" axis can feed both TensorCores
        two_step = [c for c in cands if batch // c >= 2]
        if two_step:
            return two_step[0]
    return cands[0]


# --------------------------------------------------------------------------
# In-kernel helpers
# --------------------------------------------------------------------------
def _rows_to_lanes(col):
    """(tb, 1) per-row values -> (1, tb) lane-dense, using only broadcast /
    compare / cross-sublane reduce (avoids relying on a sublane->lane reshape)."""
    tb = col.shape[0]
    r = jax.lax.broadcasted_iota(jnp.int32, (tb, tb), 0)
    c = jax.lax.broadcasted_iota(jnp.int32, (tb, tb), 1)
    return jnp.sum(jnp.where(r == c, col, jnp.float32(0.0)), axis=0, keepdims=True)


# --------------------------------------------------------------------------
# Kernel 1: all weights resident in VMEM (small / moderate n_items)
# --------------------------------------------------------------------------
def multidae_resident_kernel(n_layers, with_h, exp_dtype, x_ref, *refs):
    f32 = jnp.float32
    param_refs = refs[: 2 * n_layers]
    out_refs = refs[2 * n_layers:]
    if with_h:
        h_ref, loss_ref = out_refs
    else:
        (loss_ref,) = out_refs

    # F.normalize(x, dim=1): x * rsqrt(max(||x||^2, 1e-24)); also reduce sum(x)
    # up front so only (tb, 1) scalars (not f32 x) stay live across the layers.
    x = x_ref[...].astype(f32)
    sumsq = jnp.sum(x * x, axis=-1, keepdims=True)
    sumx = jnp.sum(x, axis=-1, keepdims=True)
    h = x * jax.lax.rsqrt(jnp.maximum(sumsq, 1e-24))

    # TODO(synk): nn.Dropout(0.5) is identity in eval mode; training-mode
    # dropout RNG is not reproduced here.

    for i in range(n_layers):
        w_ref = param_refs[2 * i]
        b = param_refs[2 * i + 1][...].astype(f32)
        h = jnp.dot(h.astype(w_ref.dtype), w_ref[...],
                    preferred_element_type=f32) + b
        if i != n_layers - 1:
            h = jnp.tanh(h)

    if with_h:
        h_ref[...] = h.astype(h_ref.dtype)

    # Per-row loss term of  -(log_softmax(h) * x).sum(-1)
    #   == -(sum(h*x) - lse * sum(x))      (no log_sm materialized)
    m = jnp.max(h, axis=-1, keepdims=True)
    p = jnp.exp((h - m).astype(exp_dtype)).astype(f32)   # bf16 EUP on v6e/v7x
    lse = m + jnp.log(jnp.sum(p, axis=-1, keepdims=True))
    x_epi = x_ref[...].astype(f32)                        # re-read resident tile
    hx = jnp.sum(h * x_epi, axis=-1, keepdims=True)
    loss_rows = -(hx - lse * sumx)                        # (tb, 1)
    loss_ref[...] = _rows_to_lanes(loss_rows)[None]       # (1, 1, tb) lane-dense


# --------------------------------------------------------------------------
# Kernel 2: first weight K-streamed / last weight N-streamed from HBM
# (manual double-buffered DMA + online log-sum-exp) -- the production-n_items
# path for v7x's 64 MiB VMEM.
# --------------------------------------------------------------------------
def multidae_streamed_kernel(n_layers, n_chunks, tn, with_h, exp_dtype, w_dtype,
                             x_ref, w0_hbm, wl_hbm, *refs):
    f32 = jnp.float32
    n_mid = n_layers - 2
    n_small = 2 + 2 * n_mid                     # b0, (w_i, b_i)*mid, b_last
    small = refs[:n_small]
    n_out = 2 if with_h else 1
    out_refs = refs[n_small:n_small + n_out]
    (w0buf, wlbuf, sems, z0_ref, m_ref, l_ref, hx_ref) = refs[n_small + n_out:]
    if with_h:
        h_ref, loss_ref = out_refs
    else:
        (loss_ref,) = out_refs

    b0_ref = small[0]
    mid_refs = small[1:1 + 2 * n_mid]
    bl_ref = small[-1]

    def w0_copy(j, slot):            # chunk j of W_first: rows [j*tn, (j+1)*tn)
        return pltpu.make_async_copy(
            w0_hbm.at[pl.ds(j * tn, tn), :], w0buf.at[slot], sems.at[0, slot])

    def wl_copy(j, slot):            # chunk j of W_last: cols [j*tn, (j+1)*tn)
        return pltpu.make_async_copy(
            wl_hbm.at[:, pl.ds(j * tn, tn)], wlbuf.at[slot], sems.at[1, slot])

    # Prime chunk 0 of both streams (the last-layer chunk overlaps with all of
    # pass A plus the middle layers).
    w0_copy(0, 0).start()
    wl_copy(0, 0).start()

    # Row stats from the resident x tile; only (tb, 1) scalars stay live.
    x_f32 = x_ref[...].astype(f32)
    sumsq = jnp.sum(x_f32 * x_f32, axis=-1, keepdims=True)
    sumx = jnp.sum(x_f32, axis=-1, keepdims=True)
    inv_norm = jax.lax.rsqrt(jnp.maximum(sumsq, 1e-24))

    # ---- layer 0, K-streamed:  z0 = x @ W0  (normalization folded in after,
    # which is mathematically identical to normalizing x first) --------------
    z0_ref[...] = jnp.zeros_like(z0_ref)

    def pass_a(j, carry):
        slot = j & 1
        w0_copy(j, slot).wait()

        @pl.when(j + 1 < n_chunks)
        def _():
            w0_copy(j + 1, 1 - slot).start()

        xj = x_ref[:, pl.ds(j * tn, tn)].astype(w_dtype)
        z0_ref[...] += jnp.dot(xj, w0buf[slot], preferred_element_type=f32)
        return carry

    jax.lax.fori_loop(0, n_chunks, pass_a, 0)

    h = jnp.tanh(z0_ref[...] * inv_norm + b0_ref[...].astype(f32))

    # ---- middle layers (small, fully resident) ------------------------------
    for i in range(n_mid):
        w_ref = mid_refs[2 * i]
        b = mid_refs[2 * i + 1][...].astype(f32)
        h = jnp.tanh(jnp.dot(h.astype(w_dtype), w_ref[...],
                             preferred_element_type=f32) + b)

    h_last_in = h.astype(w_dtype)

    # ---- last layer, N-streamed, with online log-sum-exp --------------------
    m_ref[...] = jnp.full(m_ref.shape, -jnp.inf, f32)
    l_ref[...] = jnp.zeros(l_ref.shape, f32)
    hx_ref[...] = jnp.zeros(hx_ref.shape, f32)

    def pass_b(j, carry):
        slot = j & 1
        wl_copy(j, slot).wait()

        @pl.when(j + 1 < n_chunks)
        def _():
            wl_copy(j + 1, 1 - slot).start()

        col = pl.ds(j * tn, tn)
        hj = jnp.dot(h_last_in, wlbuf[slot], preferred_element_type=f32)
        hj = hj + bl_ref[:, col].astype(f32)
        if with_h:
            h_ref[:, col] = hj.astype(h_ref.dtype)

        xj = x_ref[:, col].astype(f32)
        hx_ref[...] += jnp.sum(hj * xj, axis=-1, keepdims=True)

        m_new = jnp.maximum(m_ref[...], jnp.max(hj, axis=-1, keepdims=True))
        p = jnp.exp((hj - m_new).astype(exp_dtype)).astype(f32)
        l_ref[...] = jnp.exp(m_ref[...] - m_new) * l_ref[...] \
            + jnp.sum(p, axis=-1, keepdims=True)
        m_ref[...] = m_new
        return carry

    jax.lax.fori_loop(0, n_chunks, pass_b, 0)

    lse = m_ref[...] + jnp.log(l_ref[...])
    loss_rows = -(hx_ref[...] - lse * sumx)                # (tb, 1)
    loss_ref[...] = _rows_to_lanes(loss_rows)[None]        # (1, 1, tb)


# --------------------------------------------------------------------------
# Wrapper
# --------------------------------------------------------------------------
def _nbytes(a):
    return int(a.size) * jnp.dtype(a.dtype).itemsize


def multi_dae_forward(x, weights, biases, *, tb=None, tn_items=None,
                      mxu_dtype=jnp.bfloat16, io_dtype=jnp.bfloat16,
                      return_h=True):
    """MultiDAE forward. Returns (h or None, scalar loss)."""
    B, n_items = x.shape
    n_layers = len(weights)
    assert n_layers >= 1
    assert weights[0].shape[0] == n_items and weights[-1].shape[1] == n_items

    gen = _tpu_generation()
    vmem_cap = _vmem_capacity_bytes(gen)
    budget = vmem_cap - (16 << 20)            # leave headroom below capacity

    if tb is None:
        tb = _pick_tb(B, gen)
    assert B % tb == 0, (B, tb)
    num_tiles = B // tb

    # I/O dtype: halves the HBM<->VMEM bytes of the x / h tiles at real item
    # counts (normalize / softmax math stays f32 in-kernel).
    if io_dtype is not None:
        x = x.astype(io_dtype)
    out_dtype = x.dtype

    # MXU dtype (f32 accumulation).
    if mxu_dtype is not None and jnp.dtype(mxu_dtype) != jnp.dtype(jnp.float32):
        weights = [w.astype(mxu_dtype) for w in weights]
    w_dtype = weights[0].dtype
    biases = [b.astype(jnp.float32).reshape(1, -1) for b in biases]

    # bf16 exp for the log-sum-exp only where the EUP has bf16 throughput
    # (v6e/v7x) and only on the bf16-MXU path, so the f32 path stays exact.
    use_bf16_exp = gen in (6, 7) and jnp.dtype(w_dtype) == jnp.dtype(jnp.bfloat16)
    exp_dtype = jnp.bfloat16 if use_bf16_exp else jnp.float32

    sbuf_kw = _single_buffer_kwargs()
    pbuf = 1 if sbuf_kw else 2

    tile_io_bytes = tb * n_items * jnp.dtype(out_dtype).itemsize
    param_bytes = sum(_nbytes(p) for p in weights) + sum(_nbytes(p) for p in biases)
    resident_need = (2 * tile_io_bytes
                     + (2 * tile_io_bytes if return_h else 0)
                     + pbuf * param_bytes
                     + 3 * tb * n_items * 4)          # f32 temporaries (x, h, exp)

    # Decide whether to stream the first/last weight matrices from HBM.
    can_stream = n_layers >= 2
    if tn_items is None and can_stream and resident_need + (8 << 20) > budget:
        for c in (2048, 1024, 512, 256, 128):
            if n_items % c == 0:
                tn_items = c
                break
    use_stream = can_stream and tn_items is not None
    if tn_items is not None:
        assert can_stream, "streaming needs at least 2 layers"

    loss_spec = pl.BlockSpec((1, 1, tb), lambda i: (i, 0, 0))
    loss_shape = jax.ShapeDtypeStruct((num_tiles, 1, tb), jnp.float32)

    if not use_stream:
        in_specs = [pl.BlockSpec((tb, n_items), lambda i: (i, 0))]
        operands = [x]
        for w, b in zip(weights, biases):
            in_specs.append(pl.BlockSpec(w.shape, lambda i: (0, 0), **sbuf_kw))
            in_specs.append(pl.BlockSpec(b.shape, lambda i: (0, 0), **sbuf_kw))
            operands.extend([w, b])

        out_specs, out_shape = [], []
        if return_h:
            out_specs.append(pl.BlockSpec((tb, n_items), lambda i: (i, 0)))
            out_shape.append(jax.ShapeDtypeStruct((B, n_items), out_dtype))
        out_specs.append(loss_spec)
        out_shape.append(loss_shape)

        scratch = []
        kernel = functools.partial(multidae_resident_kernel, n_layers, return_h,
                                   exp_dtype)
        need = resident_need
    else:
        tn = int(tn_items)
        assert n_items % tn == 0 and tn % 128 == 0, (n_items, tn)
        n_chunks = n_items // tn
        d_first = weights[0].shape[1]
        d_last_in = weights[-1].shape[0]

        in_specs = [pl.BlockSpec((tb, n_items), lambda i: (i, 0)),
                    pl.BlockSpec(memory_space=pl.ANY),   # W_first (K-streamed)
                    pl.BlockSpec(memory_space=pl.ANY)]   # W_last  (N-streamed)
        operands = [x, weights[0], weights[-1]]
        small_ops = [biases[0]]
        for w, b in zip(weights[1:-1], biases[1:-1]):
            small_ops.extend([w, b])
        small_ops.append(biases[-1])
        for p in small_ops:
            in_specs.append(pl.BlockSpec(p.shape, lambda i: (0, 0), **sbuf_kw))
        operands.extend(small_ops)

        out_specs, out_shape = [], []
        if return_h:
            # NOTE: at production n_items on v7x prefer return_h=False (or a
            # smaller tb); the h tile is the largest remaining VMEM consumer.
            out_specs.append(pl.BlockSpec((tb, n_items), lambda i: (i, 0)))
            out_shape.append(jax.ShapeDtypeStruct((B, n_items), out_dtype))
        out_specs.append(loss_spec)
        out_shape.append(loss_shape)

        scratch = [pltpu.VMEM((2, tn, d_first), w_dtype),
                   pltpu.VMEM((2, d_last_in, tn), w_dtype),
                   pltpu.SemaphoreType.DMA((2, 2)),
                   pltpu.VMEM((tb, d_first), jnp.float32),
                   pltpu.VMEM((tb, 1), jnp.float32),
                   pltpu.VMEM((tb, 1), jnp.float32),
                   pltpu.VMEM((tb, 1), jnp.float32)]

        kernel = functools.partial(multidae_streamed_kernel, n_layers, n_chunks,
                                   tn, return_h, exp_dtype, w_dtype)

        wsz = jnp.dtype(w_dtype).itemsize
        need = (2 * tile_io_bytes
                + (2 * tile_io_bytes if return_h else 0)
                + pbuf * sum(_nbytes(p) for p in small_ops)
                + 2 * tn * d_first * wsz + 2 * d_last_in * tn * wsz
                + tb * d_first * 4
                + tb * n_items * 4              # f32 x copy for the row stats
                + (4 << 20))

    vmem_limit = int(min(max(need + (8 << 20), 32 << 20), budget))

    outs = pl.pallas_call(
        kernel,
        grid=(num_tiles,),
        in_specs=in_specs,
        out_specs=out_specs,
        out_shape=out_shape,
        scratch_shapes=scratch,
        compiler_params=pltpu.CompilerParams(
            dimension_semantics=("parallel",),
            vmem_limit_bytes=vmem_limit),
    )(*operands)

    if return_h:
        h, loss_tiles = outs
    else:
        (loss_tiles,) = outs
        h = None
    loss = jnp.mean(loss_tiles)
    return h, loss


# --------------------------------------------------------------------------
# Parameter init (matches MultiDAE.init_weights shapes / stds) and reference
# --------------------------------------------------------------------------
def init_params(p_dims, key):
    q_dims = p_dims[::-1]
    dims = q_dims + p_dims[1:]
    weights, biases = [], []
    for d_in, d_out in zip(dims[:-1], dims[1:]):
        key, kw, kb = jax.random.split(key, 3)
        std = np.sqrt(2.0 / (d_in + d_out))
        # stored as (in, out) == transpose of torch's (out, in) weight
        w = std * jax.random.normal(kw, (d_in, d_out), dtype=jnp.float32)
        b = 0.001 * jax.random.normal(kb, (1, d_out), dtype=jnp.float32)
        weights.append(w)
        biases.append(b)
    return weights, biases


def reference_forward(x, weights, biases, mxu_dtype=None):
    """Pure-JAX reference (eval-mode dropout). If mxu_dtype is set, the matmul
    operands are rounded to it, mirroring the kernel's MXU numerics."""
    sumsq = jnp.sum(x * x, axis=-1, keepdims=True)
    h = x * jax.lax.rsqrt(jnp.maximum(sumsq, 1e-24))
    n = len(weights)
    for i, (w, b) in enumerate(zip(weights, biases)):
        if mxu_dtype is not None:
            h_in, w_in = h.astype(mxu_dtype), w.astype(mxu_dtype)
        else:
            h_in, w_in = h, w
        h = jnp.dot(h_in, w_in, preferred_element_type=jnp.float32) + b
        if i != n - 1:
            h = jnp.tanh(h)
    log_sm = jax.nn.log_softmax(h, axis=-1)
    loss = -(log_sm * x).sum(axis=-1).mean()
    return h, loss


if __name__ == "__main__":
    # Small shapes: p_dims=[64, 128, 256] -> layers 256->128->64->128->256
    p_dims = [64, 128, 256]
    n_items = p_dims[-1]
    B = 256

    key = jax.random.PRNGKey(0)
    key, kx = jax.random.split(key)
    x = jax.random.uniform(kx, (B, n_items), dtype=jnp.float32)  # implicit feedback
    weights, biases = init_params(p_dims, key)

    # 1) exact f32 resident path vs. the PyTorch-equivalent reference.
    h32, loss32 = multi_dae_forward(x, weights, biases,
                                    mxu_dtype=None, io_dtype=None)
    jax.block_until_ready((h32, loss32))
    h_ref32, loss_ref32 = reference_forward(x, weights, biases)
    np.testing.assert_allclose(np.asarray(h32), np.asarray(h_ref32),
                               rtol=1e-3, atol=1e-3)
    np.testing.assert_allclose(np.asarray(loss32), np.asarray(loss_ref32),
                               rtol=1e-3, atol=1e-3)

    # 2) default perf path: bf16 I/O + bf16 MXU (f32 accumulate/normalize/lse),
    #    checked against a reference that rounds its operands the same way.
    xq = x.astype(jnp.bfloat16)
    h, loss = multi_dae_forward(x, weights, biases)
    jax.block_until_ready((h, loss))
    h_ref, loss_ref = reference_forward(xq.astype(jnp.float32), weights, biases,
                                        mxu_dtype=jnp.bfloat16)
    np.testing.assert_allclose(np.asarray(h.astype(jnp.float32)),
                               np.asarray(h_ref), rtol=2e-2, atol=2e-2)
    np.testing.assert_allclose(np.asarray(loss), np.asarray(loss_ref),
                               rtol=2e-2, atol=2e-2)

    # 3) loss-only path (skips the (B, n_items) h writeback).
    h_none, loss_only = multi_dae_forward(x, weights, biases, return_h=False)
    jax.block_until_ready(loss_only)
    assert h_none is None
    np.testing.assert_allclose(np.asarray(loss_only), np.asarray(loss),
                               rtol=1e-4, atol=1e-4)

    # 4) streamed (K-/N-tiled first & last weights) f32 path vs. the reference.
    h_s32, loss_s32 = multi_dae_forward(x, weights, biases, tn_items=128,
                                        mxu_dtype=None, io_dtype=None)
    jax.block_until_ready((h_s32, loss_s32))
    np.testing.assert_allclose(np.asarray(h_s32), np.asarray(h_ref32),
                               rtol=1e-3, atol=1e-3)
    np.testing.assert_allclose(np.asarray(loss_s32), np.asarray(loss_ref32),
                               rtol=1e-3, atol=1e-3)

    # 5) streamed bf16 perf path vs. the resident bf16 path.
    h_s, loss_s = multi_dae_forward(x, weights, biases, tn_items=128)
    jax.block_until_ready((h_s, loss_s))
    np.testing.assert_allclose(np.asarray(h_s.astype(jnp.float32)),
                               np.asarray(h.astype(jnp.float32)),
                               rtol=2e-2, atol=2e-2)
    np.testing.assert_allclose(np.asarray(loss_s), np.asarray(loss),
                               rtol=2e-2, atol=2e-2)

    print("KERNEL_OK")
</pallas_src>

<mosaic_0001>
module attributes {stable_mosaic.version = 11 : i64} {
  func.func @_copy_kernel(%arg0: i32, %arg1: memref<8x128xf32, #tpu.memory_space<vmem>>, %arg2: memref<8x128xf32, #tpu.memory_space<vmem>>) attributes {dimension_semantics = [#tpu.dimension_semantics<arbitrary>], iteration_bounds = array<i64: 2>, scalar_prefetch = 0 : i64, scratch_operands = 0 : i64, tpu.core_type = #tpu.core_type<tc>, window_params = [{pipeline_mode = #tpu.pipeline_mode<synchronous>, transform_indices = @transform_0, window_bounds = array<i64: 8, 128>}, {transform_indices = @transform_1, window_bounds = array<i64: 8, 128>}]} {
    %c0 = arith.constant 0 : index
    %c0_0 = arith.constant 0 : index
    %0 = vector.load %arg1[%c0, %c0_0] : memref<8x128xf32, #tpu.memory_space<vmem>>, vector<8x128xf32>
    %c0_1 = arith.constant 0 : index
    %c0_2 = arith.constant 0 : index
    %1 = vector.load %arg2[%c0_1, %c0_2] : memref<8x128xf32, #tpu.memory_space<vmem>>, vector<8x128xf32>
    tpu.vector_store %arg2[%c0_1, %c0_2], %0 {strides = array<i32>} : memref<8x128xf32, #tpu.memory_space<vmem>>, vector<8x128xf32>,
    return
  }
  func.func @transform_0(%arg0: i32) -> (i32, i32) {
    %c0_i32 = arith.constant 0 : i32
    %c0_i32_0 = arith.constant 0 : i32
    %c0_i32_1 = arith.constant 0 : i32
    return %c0_i32, %c0_i32_0 : i32, i32
  }
  func.func @transform_1(%arg0: i32) -> (i32, i32) {
    %c0_i32 = arith.constant 0 : i32
    %c0_i32_0 = arith.constant 0 : i32
    return %arg0, %c0_i32 : i32, i32
  }
}

module attributes {stable_mosaic.version = 11 : i64} {
  func.func @multidae_resident_kernel(%arg0: i32, %arg1: memref<128x256xf32, #tpu.memory_space<vmem>>, %arg2: memref<256x128xf32, #tpu.memory_space<vmem>>, %arg3: memref<1x128xf32, #tpu.memory_space<vmem>>, %arg4: memref<128x64xf32, #tpu.memory_space<vmem>>, %arg5: memref<1x64xf32, #tpu.memory_space<vmem>>, %arg6: memref<64x128xf32, #tpu.memory_space<vmem>>, %arg7: memref<1x128xf32, #tpu.memory_space<vmem>>, %arg8: memref<128x256xf32, #tpu.memory_space<vmem>>, %arg9: memref<1x256xf32, #tpu.memory_space<vmem>>, %arg10: memref<128x256xf32, #tpu.memory_space<vmem>>, %arg11: memref<1x1x128xf32, #tpu.memory_space<vmem>>) attributes {dimension_semantics = [#tpu.dimension_semantics<parallel>], iteration_bounds = array<i64: 2>, scalar_prefetch = 0 : i64, scratch_operands = 0 : i64, tpu.core_type = #tpu.core_type<tc>, window_params = [{transform_indices = @transform_0, window_bounds = array<i64: 128, 256>}, {pipeline_mode = #tpu.pipeline_mode<synchronous>, transform_indices = @transform_1, window_bounds = array<i64: 256, 128>}, {pipeline_mode = #tpu.pipeline_mode<synchronous>, transform_indices = @transform_2, window_bounds = array<i64: 1, 128>}, {pipeline_mode = #tpu.pipeline_mode<synchronous>, transform_indices = @transform_3, window_bounds = array<i64: 128, 64>}, {pipeline_mode = #tpu.pipeline_mode<synchronous>, transform_indices = @transform_4, window_bounds = array<i64: 1, 64>}, {pipeline_mode = #tpu.pipeline_mode<synchronous>, transform_indices = @transform_5, window_bounds = array<i64: 64, 128>}, {pipeline_mode = #tpu.pipeline_mode<synchronous>, transform_indices = @transform_6, window_bounds = array<i64: 1, 128>}, {pipeline_mode = #tpu.pipeline_mode<synchronous>, transform_indices = @transform_7, window_bounds = array<i64: 128, 256>}, {pipeline_mode = #tpu.pipeline_mode<synchronous>, transform_indices = @transform_8, window_bounds = array<i64: 1, 256>}, {transform_indices = @transform_9, window_bounds = array<i64: 128, 256>}, {transform_indices = @transform_10, window_bounds = array<i64: 1, 1, 128>}]} {
    %c0 = arith.constant 0 : index
    %c0_0 = arith.constant 0 : index
    %0 = vector.load %arg1[%c0, %c0_0] : memref<128x256xf32, #tpu.memory_space<vmem>>, vector<128x256xf32>
    %1 = arith.mulf %0, %0 : vector<128x256xf32>
    %cst = arith.constant dense<0.000000e+00> : vector<128xf32>
    %2 = vector.multi_reduction <add>, %1, %cst [1] : vector<128x256xf32> to vector<128xf32>
    %3 = vector.shape_cast %2 : vector<128xf32> to vector<128x1xf32>
    %cst_1 = arith.constant dense<0.000000e+00> : vector<128xf32>
    %4 = vector.multi_reduction <add>, %0, %cst_1 [1] : vector<128x256xf32> to vector<128xf32>
    %5 = vector.shape_cast %4 : vector<128xf32> to vector<128x1xf32>
    %cst_2 = arith.constant 1.000000e-24 : f32
    %6 = vector.broadcast %cst_2 : f32 to vector<128x1xf32>
    %7 = arith.maximumf %3, %6 : vector<128x1xf32>
    %8 = math.rsqrt %7 : vector<128x1xf32>
    %9 = vector.broadcast %8 : vector<128x1xf32> to vector<128x256xf32>
    %10 = arith.mulf %0, %9 : vector<128x256xf32>
    %c0_3 = arith.constant 0 : index
    %c0_4 = arith.constant 0 : index
    %11 = vector.load %arg3[%c0_3, %c0_4] : memref<1x128xf32, #tpu.memory_space<vmem>>, vector<1x128xf32>
    %c0_5 = arith.constant 0 : index
    %c0_6 = arith.constant 0 : index
    %12 = vector.load %arg2[%c0_5, %c0_6] : memref<256x128xf32, #tpu.memory_space<vmem>>, vector<256x128xf32>
    %cst_7 = arith.constant dense<0.000000e+00> : vector<128x128xf32>
    %13 = tpu.matmul %10, %12, %cst_7 {dimension_numbers = #tpu.dot_dimension_numbers<[1], [0], [0], [1], [0, 0, 1, 1], [], []>} : vector<128x256xf32>, vector<256x128xf32>, vector<128x128xf32> -> vector<128x128xf32>
    %14 = vector.broadcast %11 : vector<1x128xf32> to vector<128x128xf32>
    %15 = arith.addf %13, %14 : vector<128x128xf32>
    %16 = math.tanh %15 : vector<128x128xf32>
    %c0_8 = arith.constant 0 : index
    %c0_9 = arith.constant 0 : index
    %17 = vector.load %arg5[%c0_8, %c0_9] : memref<1x64xf32, #tpu.memory_space<vmem>>, vector<1x64xf32>
    %c0_10 = arith.constant 0 : index
    %c0_11 = arith.constant 0 : index
    %18 = vector.load %arg4[%c0_10, %c0_11] : memref<128x64xf32, #tpu.memory_space<vmem>>, vector<128x64xf32>
    %cst_12 = arith.constant dense<0.000000e+00> : vector<128x64xf32>
    %19 = tpu.matmul %16, %18, %cst_12 {dimension_numbers = #tpu.dot_dimension_numbers<[1], [0], [0], [1], [0, 0, 1, 1], [], []>} : vector<128x128xf32>, vector<128x64xf32>, vector<128x64xf32> -> vector<128x64xf32>
    %20 = vector.broadcast %17 : vector<1x64xf32> to vector<128x64xf32>
    %21 = arith.addf %19, %20 : vector<128x64xf32>
    %22 = math.tanh %21 : vector<128x64xf32>
    %c0_13 = arith.constant 0 : index
    %c0_14 = arith.constant 0 : index
    %23 = vector.load %arg7[%c0_13, %c0_14] : memref<1x128xf32, #tpu.memory_space<vmem>>, vector<1x128xf32>
    %c0_15 = arith.constant 0 : index
    %c0_16 = arith.constant 0 : index
    %24 = vector.load %arg6[%c0_15, %c0_16] : memref<64x128xf32, #tpu.memory_space<vmem>>, vector<64x128xf32>
    %cst_17 = arith.constant dense<0.000000e+00> : vector<128x128xf32>
    %25 = tpu.matmul %22, %24, %cst_17 {dimension_numbers = #tpu.dot_dimension_numbers<[1], [0], [0], [1], [0, 0, 1, 1], [], []>} : vector<128x64xf32>, vector<64x128xf32>, vector<128x128xf32> -> vector<128x128xf32>
    %26 = vector.broadcast %23 : vector<1x128xf32> to vector<128x128xf32>
    %27 = arith.addf %25, %26 : vector<128x128xf32>
    %28 = math.tanh %27 : vector<128x128xf32>
    %c0_18 = arith.constant 0 : index
    %c0_19 = arith.constant 0 : index
    %29 = vector.load %arg9[%c0_18, %c0_19] : memref<1x256xf32, #tpu.memory_space<vmem>>, vector<1x256xf32>
    %c0_20 = arith.constant 0 : index
    %c0_21 = arith.constant 0 : index
    %30 = vector.load %arg8[%c0_20, %c0_21] : memref<128x256xf32, #tpu.memory_space<vmem>>, vector<128x256xf32>
    %cst_22 = arith.constant dense<0.000000e+00> : vector<128x256xf32>
    %31 = tpu.matmul %28, %30, %cst_22 {dimension_numbers = #tpu.dot_dimension_numbers<[1], [0], [0], [1], [0, 0, 1, 1], [], []>} : vector<128x128xf32>, vector<128x256xf32>, vector<128x256xf32> -> vector<128x256xf32>
    %32 = vector.broadcast %29 : vector<1x256xf32> to vector<128x256xf32>
    %33 = arith.addf %31, %32 : vector<128x256xf32>
    %c0_23 = arith.constant 0 : index
    %c0_24 = arith.constant 0 : index
    %34 = vector.load %arg10[%c0_23, %c0_24] : memref<128x256xf32, #tpu.memory_space<vmem>>, vector<128x256xf32>
    tpu.vector_store %arg10[%c0_23, %c0_24], %33 {strides = array<i32>} : memref<128x256xf32, #tpu.memory_space<vmem>>, vector<128x256xf32>,
    %cst_25 = arith.constant dense<0xFF800000> : vector<128xf32>
    %35 = vector.multi_reduction <maximumf>, %33, %cst_25 [1] : vector<128x256xf32> to vector<128xf32>
    %36 = vector.shape_cast %35 : vector<128xf32> to vector<128x1xf32>
    %37 = vector.broadcast %36 : vector<128x1xf32> to vector<128x256xf32>
    %38 = arith.subf %33, %37 : vector<128x256xf32>
    %39 = math.exp %38 : vector<128x256xf32>
    %cst_26 = arith.constant dense<0.000000e+00> : vector<128xf32>
    %40 = vector.multi_reduction <add>, %39, %cst_26 [1] : vector<128x256xf32> to vector<128xf32>
    %41 = vector.shape_cast %40 : vector<128xf32> to vector<128x1xf32>
    %42 = math.log %41 : vector<128x1xf32>
    %43 = arith.addf %36, %42 : vector<128x1xf32>
    %c0_27 = arith.constant 0 : index
    %c0_28 = arith.constant 0 : index
    %44 = vector.load %arg1[%c0_27, %c0_28] : memref<128x256xf32, #tpu.memory_space<vmem>>, vector<128x256xf32>
    %45 = arith.mulf %33, %44 : vector<128x256xf32>
    %cst_29 = arith.constant dense<0.000000e+00> : vector<128xf32>
    %46 = vector.multi_reduction <add>, %45, %cst_29 [1] : vector<128x256xf32> to vector<128xf32>
    %47 = vector.shape_cast %46 : vector<128xf32> to vector<128x1xf32>
    %48 = arith.mulf %43, %5 : vector<128x1xf32>
    %49 = arith.subf %47, %48 : vector<128x1xf32>
    %cst_30 = arith.constant 0.000000e+00 : f32
    %50 = vector.broadcast %cst_30 : f32 to vector<128x1xf32>
    %51 = arith.subf %50, %49 : vector<128x1xf32>
    %52 = tpu.iota {dimensions = array<i32: 0>} : vector<128x128xi32>
    %53 = tpu.iota {dimensions = array<i32: 1>} : vector<128x128xi32>
    %54 = arith.cmpi eq, %52, %53 : vector<128x128xi32>
    %cst_31 = arith.constant 0.000000e+00 : f32
    %55 = vector.shape_cast %51 : vector<128x1xf32> to vector<128x1xf32>
    %56 = vector.broadcast %55 : vector<128x1xf32> to vector<128x128xf32>
    %57 = vector.broadcast %cst_31 : f32 to vector<128x128xf32>
    %58 = arith.select %54, %56, %57 : vector<128x128xi1>, vector<128x128xf32>
    %cst_32 = arith.constant dense<0.000000e+00> : vector<128xf32>
    %59 = vector.multi_reduction <add>, %58, %cst_32 [0] : vector<128x128xf32> to vector<128xf32>
    %60 = vector.shape_cast %59 : vector<128xf32> to vector<1x128xf32>
    %61 = vector.shape_cast %60 : vector<1x128xf32> to vector<1x1x128xf32>
    %c0_33 = arith.constant 0 : index
    %c0_34 = arith.constant 0 : index
    %c0_35 = arith.constant 0 : index
    %62 = vector.load %arg11[%c0_33, %c0_34, %c0_35] : memref<1x1x128xf32, #tpu.memory_space<vmem>>, vector<1x1x128xf32>
    tpu.vector_store %arg11[%c0_33, %c0_34, %c0_35], %61 {strides = array<i32>} : memref<1x1x128xf32, #tpu.memory_space<vmem>>, vector<1x1x128xf32>,
    return
  }
  func.func @transform_0(%arg0: i32) -> (i32, i32) {
    %c0_i32 = arith.constant 0 : i32
    %c0_i32_0 = arith.constant 0 : i32
    return %arg0, %c0_i32 : i32, i32
  }
  func.func @transform_1(%arg0: i32) -> (i32, i32) {
    %c0_i32 = arith.constant 0 : i32
    %c0_i32_0 = arith.constant 0 : i32
    %c0_i32_1 = arith.constant 0 : i32
    return %c0_i32, %c0_i32_0 : i32, i32
  }
  func.func @transform_2(%arg0: i32) -> (i32, i32) {
    %c0_i32 = arith.constant 0 : i32
    %c0_i32_0 = arith.constant 0 : i32
    %c0_i32_1 = arith.constant 0 : i32
    return %c0_i32, %c0_i32_0 : i32, i32
  }
  func.func @transform_3(%arg0: i32) -> (i32, i32) {
    %c0_i32 = arith.constant 0 : i32
    %c0_i32_0 = arith.constant 0 : i32
    %c0_i32_1 = arith.constant 0 : i32
    return %c0_i32, %c0_i32_0 : i32, i32
  }
  func.func @transform_4(%arg0: i32) -> (i32, i32) {
    %c0_i32 = arith.constant 0 : i32
    %c0_i32_0 = arith.constant 0 : i32
    %c0_i32_1 = arith.constant 0 : i32
    return %c0_i32, %c0_i32_0 : i32, i32
  }
  func.func @transform_5(%arg0: i32) -> (i32, i32) {
    %c0_i32 = arith.constant 0 : i32
    %c0_i32_0 = arith.constant 0 : i32
    %c0_i32_1 = arith.constant 0 : i32
    return %c0_i32, %c0_i32_0 : i32, i32
  }
  func.func @transform_6(%arg0: i32) -> (i32, i32) {
    %c0_i32 = arith.constant 0 : i32
    %c0_i32_0 = arith.constant 0 : i32
    %c0_i32_1 = arith.constant 0 : i32
    return %c0_i32, %c0_i32_0 : i32, i32
  }
  func.func @transform_7(%arg0: i32) -> (i32, i32) {
    %c0_i32 = arith.constant 0 : i32
    %c0_i32_0 = arith.constant 0 : i32
    %c0_i32_1 = arith.constant 0 : i32
    return %c0_i32, %c0_i32_0 : i32, i32
  }
  func.func @transform_8(%arg0: i32) -> (i32, i32) {
    %c0_i32 = arith.constant 0 : i32
    %c0_i32_0 = arith.constant 0 : i32
    %c0_i32_1 = arith.constant 0 : i32
    return %c0_i32, %c0_i32_0 : i32, i32
  }
  func.func @transform_9(%arg0: i32) -> (i32, i32) {
    %c0_i32 = arith.constant 0 : i32
    %c0_i32_0 = arith.constant 0 : i32
    return %arg0, %c0_i32 : i32, i32
  }
  func.func @transform_10(%arg0: i32) -> (i32, i32, i32) {
    %c0_i32 = arith.constant 0 : i32
    %c0_i32_0 = arith.constant 0 : i32
    %c0_i32_1 = arith.constant 0 : i32
    return %arg0, %c0_i32, %c0_i32_0 : i32, i32, i32
  }
}

</mosaic_0001>

<bundles_post_ra>
// kernel: tpu_custom_call.1
= control target key start
LH: loop header
LB: loop body
LE: loop exit
PB: predicated region body
PF: predicated region fallthrough
CT: control target
= control target key end

     0   :  { %6 = vsyncpa [#allocation3], 0  ;;  %s481_s0 = inlined_call_operand.hbm [shape: f32[8,128], index: 0, kind: input, shape index: {}]   ;;  %s482_s1 = inlined_call_operand.hbm [shape: f32[16,128], index: 1, kind: output, shape index: {}]  }
   0x1   :  { %7 = vsyncpa [#allocation4], 0 }
   0x2   :  { %9 = vsyncpa [#allocation4 + $0x1], 0  ;;  %s351_s6 = smov 0   ;;  %s353_s7 = smov 0  }
   0x3   :  { %s355_s8 = smov 0   ;;  %s357_s9 = smov 0  }
   0x4 LB: > { %s372_s10 = sadd.s32 4294967295, %s337_s9   ;;  %s183_s11 = sadd.s32 4294967294, %s337_s9   ;;  %s337_s9 = sphi %s357_s9, %s498_s9   ;;  %s333_s8 = sphi %s355_s8, %s497_s8   ;;  %s329_s7 = sphi %s353_s7, %s496_s7   ;;  %s325_s6 = sphi %s351_s6, %s495_s6  }
   0x5   : > { %s376_s12 = sadd.s32 1, %s337_s9   ;;  %s43_s13 = sadd.s32 1, %s333_s8 }
   0x6   : > { %s40_s14 = ssub.s32 %s337_s9, %s376_s12  ;;  %p53_p0 = scmp.ne.s32.totalorder %s333_s8, %s329_s7 }
   0x7   : > { %p41_p1 = scmp.eq.s32.totalorder %s40_s14, 0  ;;  %p54_p2 = scmp.eq.s32.totalorder %s372_s10, 1 }
   0x8   : > { %p59_p3 = scmp.ne.s32.totalorder %s329_s7, %s325_s6  ;;  %p60_p4 = scmp.eq.s32.totalorder %s183_s11, 1 }
   0x9   : > { %s387_s15 = scalar_select %p41_p1, %s333_s8, %s43_s13  }
   0xa   : > { %p389_p5 = por %p54_p2, %p53_p0  ;;  %p393_p6 = por %p60_p4, %p59_p3 }
   0xb   : > { %p184_p7 = scmp.ge.s32.totalorder %s337_s9, 1  ;;  %p67_p8 = scmp.lt.s32.totalorder %s337_s9, 3 }
   0xc   : > { %s486_s16 = scalar_select %p389_p5, 1, 0 }
   0xd   : > { %s487_s17 = scalar_select %p393_p6, 1, 0 }
   0xe   : > { %p483_p9 = scmp.eq.s32.totalorder %s372_s10, 0  ;;  %p400_p10 = pnand %p184_p7, %p67_p8 }
   0xf   : > { %s339_s19 = smov [#allocation2]   ;;  %s243_s24 = scalar_lea.hbm %s481_s0, 128 }
  0x10   : > { %s488_s18 = scalar_select %p400_p10, 1, 0 }
  0x11   : > { %s80_s20 = sshll.u32 %s339_s19, 4  ;;  %p199_p11 = pneg %p400_p10  ;;  %s81_s20 = int_to_ptr.vmem [resolvable:$true] %s80_s20 }
  0x12   : > { %p244_p13 = scmp.ne.s32.totalorder %s481_s0, %s243_s24  ;;  %p250_p3 = scmp.lt.u32.totalorder %s243_s24, %s481_s0 }
  0x13   : > { %p408_p12 = pnand %p483_p9, %p199_p11 }
  0x15   : > { %p245_p0 = pneg %p408_p12 }
  0x17   : > { %p246_p1 = pnand %p245_p0, %p244_p13 }
  0x19   : > { %p247_p2 = pneg %p246_p1 }
  0x1b   : > { %p252_p4 = pnand %p250_p3, %p247_p2 }
  0x1d   : > { %255 = shalt.err (!%p252_p4)
}
  0x1e   : > { %s256_s29 = scalar_lea.vmem %s81_s20, 128  ;;  %p264_p9 = scmp.lt.s32.totalorder %s81_s20, %s81_s20 }
  0x1f   : > { %p257_p7 = scmp.ne.s32.totalorder %s81_s20, %s256_s29  ;;  %p265_p6 = scmp.lt.s32.totalorder %s256_s29, %s256_s29 }
  0x21   : > { %p259_p8 = pnand %p257_p7, %p245_p0  ;;  %p266_p5 = por %p265_p6, %p264_p9 }
  0x23   : > { %p260_p11 = pneg %p259_p8 }
  0x25   : > { %p267_p10 = pnand %p266_p5, %p260_p11 }
  0x27   : > { %270 = shalt.err (!%p267_p10)
}
  0x28   : > { %202 = dma.hbm_to_vmem [thread:$0]  (!%p408_p12), %s481_s0, 128, %s81_s20, [#allocation3]  }
  0x29   : > { %p490_p13 = scmp.ne.s32.totalorder %s488_s18, 0 }
  0x2a   : > { %p491_p1 = scmp.eq.s32.totalorder (!%p490_p13), %s372_s10, 0 }
  0x2b   : > { %93 = sbr.rel (%p490_p13) target bundleno = 77 (0x4d), region = 24 }
  0x32   : > { %316 = dma.done.wait (%p491_p1), [#allocation3], 128   ;;  %p492_p0 = pmov %p491_p1 }
  0x33   : > { %s105_s3 = sand.u32 1, %s329_s7   ;;  %s190_s13 = sshll.u32 %s372_s10, 7  ;;  %v108_v0 = vld [vmem:[#allocation2] sm:$0xff] }
  0x34   : > { %318 = vsyncadd (%p492_p0), [#allocation3], 4294967168  ;;  %s188_s4 = sshll.u32 %s105_s3, 3  ;;  %s441_s18 = scalar_lea.hbm %s482_s1, %s190_s13 }
  0x35   : > { %s107_s5 = scalar_lea.vmem [#allocation5], %s188_s4  ;;  %s111_s20 = scalar_lea.sflag [#allocation4], %s105_s3 }
  0x36   : > { %s124_s11 = sshll.u32 %s107_s5, 4  ;;  %109 = vst [vmem:[%s107_s5] sm:$0xff] %v108_v0  ;;  %p493_p6 = scmp.ne.s32.totalorder %s486_s16, 0  ;;  %s436_s11 = int_to_ptr.vmem [resolvable:$true] %s124_s11 }
  0x37   : > { %s271_s21 = scalar_lea.vmem %s436_s11, 128  ;;  %s340_s22 = smov [#allocation5]  }
  0x38   : > { %p272_p5 = scmp.ne.s32.totalorder %s436_s11, %s271_s21  ;;  %s275_s10 = sshll.u32 %s340_s22, 4  ;;  %s276_s10 = int_to_ptr.vmem [resolvable:$false] %s275_s10 }
  0x39   : > { %s277_s23 = scalar_lea.vmem %s276_s10, 256  ;;  %p278_p12 = scmp.lt.s32.totalorder %s436_s11, %s276_s10 }
  0x3a   : > { %p273_p9 = pnand %p272_p5, %p493_p6  ;;  %p279_p2 = scmp.lt.s32.totalorder %s277_s23, %s271_s21 }
  0x3c   : > { %p274_p10 = pneg %p273_p9  ;;  %p280_p3 = por %p279_p2, %p278_p12 }
  0x3e   : > { %p281_p4 = pnand %p280_p3, %p274_p10 }
  0x40   : > { %284 = shalt.err (!%p281_p4)
}
  0x41   : > { %s285_s24 = scalar_lea.hbm %s441_s18, 128  ;;  %s289_s27 = scalar_lea.hbm %s482_s1, 256 }
  0x42   : > { %p286_p7 = scmp.ne.s32.totalorder %s441_s18, %s285_s24  ;;  %p290_p13 = scmp.lt.u32.totalorder %s441_s18, %s482_s1 }
  0x43   : > { %p291_p1 = scmp.lt.u32.totalorder %s289_s27, %s285_s24  ;;  %p293_p5 = scmp.lt.u32.totalorder %s285_s24, %s441_s18 }
  0x44   : > { %p287_p8 = pnand %p286_p7, %p493_p6 }
  0x45   : > { %p292_p0 = por %p291_p1, %p290_p13 }
  0x46   : > { %p288_p11 = pneg %p287_p8 }
  0x47   : > { %p294_p9 = por %p293_p5, %p292_p0 }
  0x49   : > { %p295_p10 = pnand %p294_p9, %p288_p11 }
  0x4b   : > { %298 = shalt.err (!%p295_p10)
}
  0x4c   : > { %197 = dma.vmem_to_hbm [thread:$0]  (%p493_p6), %s436_s11, 128, %s441_s18, %s111_s20  }
  0x4d PF: > { %p209_p12 = scmp.ge.s32.totalorder %s337_s9, 2  ;;  %s136_s30 = sand.u32 1, %s325_s6  }
  0x4e   : > { %p494_p2 = scmp.ne.s32.totalorder %s487_s17, 0  ;;  %s137_s2 = scalar_lea.sflag [#allocation4], %s136_s30 }
  0x50   : > { %p204_p3 = pnand %p209_p12, %p494_p2 }
  0x52   : > { %320 = dma.done.wait (!%p204_p3), %s137_s2, 128  }
  0x53   : > { %322 = vsyncadd (!%p204_p3), %s137_s2, 4294967168  ;;  %p12_p4 = scmp.ge.s32.totalorder %s376_s12, 4   ;;  %s495_s6 = smov %s329_s7 }
  0x54   : > { %s496_s7 = smov %s333_s8  ;;  %s497_s8 = smov %s387_s15 }
  0x55   : > { %s498_s9 = smov %s376_s12  ;;  %14 = sbr.rel (!%p12_p4) target bundleno = 4 (0x4), region = 61 }
  0x5c   :  { %142 = vsyncpa [#allocation3], 1 }
  0x5d   :  { %144 = vsyncpa [#allocation3 + $0x1], 1 }
  0x5e   :  { %145 = vsyncpa [#allocation4], 1 }
  0x5f   :  { %147 = vsyncpa [#allocation4 + $0x1], 1 }

// kernel: tpu_custom_call.1
= control target key start
LH: loop header
LB: loop body
LE: loop exit
PB: predicated region body
PF: predicated region fallthrough
CT: control target
= control target key end

     0   :  { %16 = vsyncpa [#allocation3], 0  ;;  %s4285_s0 = inlined_call_operand.hbm [shape: f32[256,256], index: 0, kind: input, shape index: {}]   ;;  %s4286_s1 = inlined_call_operand.hbm [shape: f32[256,128], index: 1, kind: input, shape index: {}]   ;;  %s4287_s2 = inlined_call_operand.vmem [shape: f32[1,128], index: 2, kind: input, shape index: {}]   ;;  %s4288_s3 = inlined_call_operand.vmem [shape: f32[128,64], index: 3, kind: input, shape index: {}]   ;;  %s4289_s4 = inlined_call_operand.vmem [shape: f32[1,64], index: 4, kind: input, shape index: {}]   ;;  %s4290_s5 = inlined_call_operand.vmem [shape: f32[64,128], index: 5, kind: input, shape index: {}]   ;;  %s4291_s6 = inlined_call_operand.vmem [shape: f32[1,128], index: 6, kind: input, shape index: {}]   ;;  %s4292_s7 = inlined_call_operand.hbm [shape: f32[128,256], index: 7, kind: input, shape index: {}]   ;;  %s4293_s8 = inlined_call_operand.vmem [shape: f32[1,256], index: 8, kind: input, shape index: {}]   ;;  %s4294_s9 = inlined_call_operand.hbm [shape: f32[256,256], index: 9, kind: output, shape index: {0}]   ;;  %s4295_s10 = inlined_call_operand.hbm [shape: f32[2,1,128], index: 10, kind: output, shape index: {1}]  }
   0x1   :  { %18 = vsyncpa [#allocation3 + $0x1], 0 }
   0x2   :  { %19 = vsyncpa [#allocation6], 0 }
   0x3   :  { %20 = vsyncpa [#allocation4], 0 }
   0x4   :  { %22 = vsyncpa [#allocation4 + $0x1], 0 }
   0x5   :  { %23 = vsyncpa [#allocation10], 0 }
   0x6   :  { %25 = vsyncpa [#allocation10 + $0x1], 0  ;;  %s3111_s13 = smov 0   ;;  %s3113_s14 = smov 0  }
   0x7   :  { %s3115_s15 = smov 0   ;;  %s3117_s16 = smov 0  }
   0x8 LB: > { %4303 = sst [smem:[#allocation15_spill]] %s3030_s13  ;;  %s3132_s17 = sadd.s32 4294967295, %s3042_s16   ;;  %s3042_s16 = sphi %s3117_s16, %s4325_s16   ;;  %s3038_s15 = sphi %s3115_s15, %s4324_s15   ;;  %s3034_s14 = sphi %s3113_s14, %s4323_s14   ;;  %s3030_s13 = sphi %s3111_s13, %s4322_s13  }
   0x9   : > { %s2115_s18 = sadd.s32 4294967294, %s3042_s16   ;;  %p51_p0 = scmp.ne.s32.totalorder %s3034_s14, %s3030_s13 }
   0xa   : > { %p4296_p1 = scmp.eq.s32.totalorder %s3132_s17, 0  ;;  %p249_p3 = scmp.eq.s32.totalorder %s2115_s18, 1 }
   0xb   : > { %p2116_p5 = scmp.ge.s32.totalorder %s3042_s16, 1  ;;  %p282_p7 = scmp.lt.s32.totalorder %s3042_s16, 3 }
   0xc   : > { %p3141_p4 = por %p4296_p1, %p51_p0  ;;  %p3146_p6 = por %p249_p3, %p51_p0 }
   0xd   : > { %p3151_p8 = pnand %p2116_p5, %p282_p7  ;;  %s3044_s22 = smov [#allocation5]  }
   0xe   : > { %s4304_s19 = scalar_select %p3141_p4, 1, 0 }
   0xf   : > { %s4305_s20 = scalar_select %p3146_p6, 1, 0 }
  0x10   : > { %s294_s23 = sshll.u32 %s3044_s22, 4  ;;  %p2533_p9 = pneg %p3151_p8  ;;  %s3155_s23 = int_to_ptr.vmem [resolvable:$true] %s294_s23 }
  0x11   : > { %4306 = sst [smem:[#allocation16_spill]] %s4305_s20  ;;  %s3045_s25 = smov [#allocation7]  }
  0x12   : > { %p3162_p11 = pnand %p2533_p9, %p4296_p1  ;;  %s322_s26 = sshll.u32 %s3045_s25, 4  ;;  %s3166_s26 = int_to_ptr.vmem [resolvable:$true] %s322_s26 }
  0x13   : > { %s2854_s29 = scalar_lea.hbm %s4286_s1, 4096 }
  0x14   : > { %p2855_p12 = scmp.ne.s32.totalorder %s4286_s1, %s2854_s29  ;;  %p2856_p13 = pneg %p3162_p11 }
  0x15   : > { %p2861_p5 = scmp.lt.u32.totalorder %s2854_s29, %s4286_s1 }
  0x16   : > { %p2857_p0 = pnand %p2856_p13, %p2855_p12 }
  0x18   : > { %p2858_p3 = pneg %p2857_p0 }
  0x1a   : > { %p2863_p7 = pnand %p2861_p5, %p2858_p3 }
  0x1c   : > { %2866 = shalt.err (!%p2863_p7)
}
  0x1d   : > { %s2867_s22 = scalar_lea.vmem %s3155_s23, 4096  ;;  %p2875_p2 = scmp.lt.s32.totalorder %s3155_s23, %s3155_s23 }
  0x1e   : > { %p2868_p9 = scmp.ne.s32.totalorder %s3155_s23, %s2867_s22  ;;  %p2876_p12 = scmp.lt.s32.totalorder %s2867_s22, %s2867_s22 }
  0x20   : > { %p2870_p10 = pnand %p2868_p9, %p2856_p13  ;;  %p2877_p0 = por %p2876_p12, %p2875_p2 }
  0x22   : > { %p2871_p1 = pneg %p2870_p10 }
  0x24   : > { %p2878_p6 = pnand %p2877_p0, %p2871_p1 }
  0x26   : > { %2881 = shalt.err (!%p2878_p6)
}
  0x27   : > { %s3046_s25 = smov 128   ;;  %s3047_s27 = smov 8  }
  0x28   : > { %2536 = dma.hbm_to_vmem [thread:$0]  (!%p3162_p11), %s4286_s1, 4096, %s3155_s23, [#allocation6], %s3046_s25, %s3046_s25, %s3047_s27  }
  0x29   : > { %s2882_s12 = scalar_lea.hbm %s4292_s7, 4096 }
  0x2a   : > { %p2883_p2 = scmp.ne.s32.totalorder %s4292_s7, %s2882_s12  ;;  %p2889_p10 = scmp.lt.u32.totalorder %s2882_s12, %s4292_s7 }
  0x2c   : > { %p2885_p1 = pnand %p2883_p2, %p2856_p13 }
  0x2e   : > { %p2886_p6 = pneg %p2885_p1 }
  0x30   : > { %p2891_p3 = pnand %p2889_p10, %p2886_p6 }
  0x32   : > { %2894 = shalt.err (!%p2891_p3)
}
  0x33   : > { %s2895_s23 = scalar_lea.vmem %s3166_s26, 4096  ;;  %p2903_p12 = scmp.lt.s32.totalorder %s3166_s26, %s3166_s26 }
  0x34   : > { %p2896_p5 = scmp.ne.s32.totalorder %s3166_s26, %s2895_s23  ;;  %p2904_p0 = scmp.lt.s32.totalorder %s2895_s23, %s2895_s23 }
  0x36   : > { %p2898_p7 = pnand %p2896_p5, %p2856_p13  ;;  %p2905_p2 = por %p2904_p0, %p2903_p12 }
  0x38   : > { %p2899_p9 = pneg %p2898_p7 }
  0x3a   : > { %p2906_p1 = pnand %p2905_p2, %p2899_p9 }
  0x3c   : > { %2909 = shalt.err (!%p2906_p1)
}
  0x3d   : > { %s4299_s13 = smov 256   ;;  %s4300_s20 = smov 16  }
  0x3e   : > { %2539 = dma.hbm_to_vmem [thread:$0]  (!%p3162_p11), %s4292_s7, 4096, %s3166_s26, [#allocation6], %s4299_s13, %s4299_s13, %s4300_s20  }
  0x3f   : > { %s3224_s28 = sadd.s32 1, %s3042_s16   ;;  %s38_s30 = sadd.s32 1, %s3038_s15 }
  0x40   : > { %s35_s29 = ssub.s32 %s3042_s16, %s3224_s28  ;;  %p45_p6 = scmp.ne.s32.totalorder %s3038_s15, %s3034_s14 }
  0x41   : > { %p36_p13 = scmp.eq.s32.totalorder %s35_s29, 0  ;;  %p46_p10 = scmp.eq.s32.totalorder %s3042_s16, 0 }
  0x42   : > { %p4309_p5 = scmp.eq.s32.totalorder %s3132_s17, 1  ;;  %p2553_p9 = scmp.lt.s32.totalorder %s3042_s16, 2 }
  0x43   : > { %s3233_s11 = scalar_select %p36_p13, %s3038_s15, %s38_s30  }
  0x44   : > { %p47_p3 = por %p46_p10, %p45_p6  ;;  %p3237_p7 = por %p4309_p5, %p45_p6 }
  0x45   : > { %s339_s12 = sand.u32 1, %s3038_s15   ;;  %s2156_s26 = sshll.u32 %s3042_s16, 12 }
  0x46   : > { %s4310_s24 = scalar_select %p3237_p7, 1, 0 }
  0x47   : > { %s2120_s18 = sshll.u32 %s339_s12, 8  ;;  %s3247_s25 = scalar_lea.hbm %s4285_s0, %s2156_s26 }
  0x48   : > { %s343_s27 = scalar_lea.vmem [#allocation2], %s2120_s18  ;;  %p3251_p11 = pnand %p2553_p9, %p47_p3 }
  0x49   : > { %s351_s29 = sshll.u32 %s343_s27, 4  ;;  %s3255_s13 = scalar_lea.sflag [#allocation3], %s339_s12  ;;  %s3249_s29 = int_to_ptr.vmem [resolvable:$true] %s351_s29 }
  0x4a   : > { %s2910_s20 = scalar_lea.hbm %s3247_s25, 4096  ;;  %p2912_p0 = pneg %p3251_p11 }
  0x4b   : > { %p2911_p12 = scmp.ne.s32.totalorder %s3247_s25, %s2910_s20  ;;  %s2915_s22 = scalar_lea.hbm %s4285_s0, 8192 }
  0x4c   : > { %p2916_p13 = scmp.lt.u32.totalorder %s3247_s25, %s4285_s0  ;;  %p2917_p6 = scmp.lt.u32.totalorder %s2915_s22, %s2910_s20 }
  0x4d   : > { %p2913_p2 = pnand %p2912_p0, %p2911_p12  ;;  %p2919_p3 = scmp.lt.u32.totalorder %s2910_s20, %s3247_s25 }
  0x4e   : > { %p2918_p10 = por %p2917_p6, %p2916_p13 }
  0x4f   : > { %p2914_p1 = pneg %p2913_p2 }
  0x50   : > { %p2920_p5 = por %p2919_p3, %p2918_p10 }
  0x52   : > { %p2921_p9 = pnand %p2920_p5, %p2914_p1 }
  0x54   : > { %2924 = shalt.err (!%p2921_p9)
}
  0x55   : > { %s2925_s12 = scalar_lea.vmem %s3249_s29, 4096  ;;  %s3050_s18 = smov [#allocation2]  }
  0x56   : > { %p2926_p12 = scmp.ne.s32.totalorder %s3249_s29, %s2925_s12  ;;  %s2930_s26 = sshll.u32 %s3050_s18, 4  ;;  %s2931_s26 = int_to_ptr.vmem [resolvable:$false] %s2930_s26 }
  0x57   : > { %s2932_s23 = scalar_lea.vmem %s2931_s26, 8192  ;;  %p2933_p4 = scmp.lt.s32.totalorder %s3249_s29, %s2931_s26 }
  0x58   : > { %p2928_p2 = pnand %p2926_p12, %p2912_p0  ;;  %p2934_p13 = scmp.lt.s32.totalorder %s2932_s23, %s2925_s12 }
  0x5a   : > { %p2929_p7 = pneg %p2928_p2  ;;  %p2935_p6 = por %p2934_p13, %p2933_p4 }
  0x5c   : > { %p2936_p10 = pnand %p2935_p6, %p2929_p7 }
  0x5e   : > { %2939 = shalt.err (!%p2936_p10)
}
  0x5f   : > { %s4312_s20 = smov 16   ;;  %s4313_s22 = smov 256  }
  0x60   : > { %2543 = dma.hbm_to_vmem [thread:$0]  (!%p3251_p11), %s3247_s25, 4096, %s3249_s29, %s3255_s13, %s4313_s22, %s4313_s22, %s4312_s20  }
  0x61   : > { %363 = sbr.rel (%p3151_p8) target bundleno = 1586 (0x632), region = 56  ;;  %s3289_s27 = sand.u32 (!%p3151_p8), 1, %s3034_s14  }
  0x62   : > { %s2125_s12 = sshll.u32 (!%p3151_p8), %s3289_s27, 8  ;;  %s366_s18 = scalar_lea.sflag (!%p3151_p8), [#allocation3], %s3289_s27 }
  0x63   : > { %s3295_s30 = scalar_lea.vmem (!%p3151_p8), [#allocation2], %s2125_s12  ;;  %p4314_p4 = scmp.ne.s32.totalorder (!%p3151_p8), %s4304_s19, 0 }
  0x68   : > { %3013 = dma.done.wait (%p4314_p4), %s366_s18, 4096  }
  0x69   : > { %3015 = vsyncadd (%p4314_p4), %s366_s18, 4294963200  ;;  %p4315_p7 = scmp.eq.s32.totalorder %s3132_s17, 0 }
  0x6b   : > { %3017 = dma.done.wait (%p4315_p7), [#allocation6], 8192   ;;  %p4316_p8 = pmov %p4315_p7 }
  0x6c   : > { %v3306_v0 = vld [vmem:[%s3295_s30] sm:$0xff]  ;;  %v3309_v1 = vld [vmem:[%s3295_s30 + $0x8] sm:$0xff]  ;;  %v3312_v2 = vld [vmem:[%s3295_s30 + $0x10] sm:$0xff]  ;;  %vm1043_vm0 = vcmask 523264   ;;  %s3688_s23 = scalar_lea.vmem [#allocation8], %s2125_s12  ;;  %s2158_s12 = sshll.u32 %s3132_s17, 12 }
  0x6d   : > { %3019 = vsyncadd (%p4316_p8), [#allocation6], 4294959104  ;;  %v452_v3 = vmul.f32 %v3306_v0, %v3306_v0  ;;  %v453_v4 = vmul.f32 %v3309_v1, %v3309_v1  ;;  %v3319_v5 = vld [vmem:[%s3295_s30 + $0x18] sm:$0xff]  ;;  %v454_v6 = vmul.f32 %v3312_v2, %v3312_v2  ;;  %v3324_v7 = vld [vmem:[%s3295_s30 + $0x20] sm:$0xff]  ;;  %s4084_s22 = scalar_lea.hbm %s4294_s9, %s2158_s12  ;;  %s1982_s18 = sshll.u32 %s3688_s23, 4  ;;  %s4089_s18 = int_to_ptr.vmem [resolvable:$true] %s1982_s18 }
  0x6e   : > { %v3327_v8 = vld [vmem:[%s3295_s30 + $0x28] sm:$0xff]  ;;  %v455_v9 = vmul.f32 %v3319_v5, %v3319_v5  ;;  %v456_v10 = vmul.f32 %v3324_v7, %v3324_v7  ;;  %v3336_v12 = vld [vmem:[%s3295_s30 + $0x30] sm:$0xff]  ;;  %v3339_v13 = vld [vmem:[%s3295_s30 + $0x38] sm:$0xff]  ;;  %s1964_s19 = scalar_lea.sflag [#allocation4], %s3289_s27  ;;  %s2940_s21 = scalar_lea.vmem %s4089_s18, 4096 }
  0x6f   : > { %v457_v11 = vmul.f32 %v3327_v8, %v3327_v8  ;;  %v3342_v14 = vld [vmem:[%s3295_s30 + $0x40] sm:$0xff]  ;;  %v484_v15 = vadd.f32 %v453_v4, %v452_v3  ;;  %v458_v16 = vmul.f32 %v3336_v12, %v3336_v12  ;;  %v459_v17 = vmul.f32 %v3339_v13, %v3339_v13  ;;  %v3349_v18 = vld [vmem:[%s3295_s30 + $0x48] sm:$0xff]  ;;  %v3352_v19 = vld [vmem:[%s3295_s30 + $0x50] sm:$0xff]  ;;  %p2941_p11 = scmp.ne.s32.totalorder %s4089_s18, %s2940_s21  ;;  %p4317_p0 = scmp.ne.s32.totalorder %s4310_s24, 0 }
  0x70   : > { %v3355_v20 = vld [vmem:[%s3295_s30 + $0x58] sm:$0xff]  ;;  %v487_v22 = vadd.f32 %v455_v9, %v454_v6  ;;  %v460_v23 = vmul.f32 %v3342_v14, %v3342_v14  ;;  %v461_v24 = vmul.f32 %v3349_v18, %v3349_v18  ;;  %v462_v26 = vmul.f32 %v3352_v19, %v3352_v19  ;;  %v3366_v28 = vld [vmem:[%s3295_s30 + $0x60] sm:$0xff]  ;;  %v3369_v29 = vld [vmem:[%s3295_s30 + $0x68] sm:$0xff]  ;;  %s3052_s13 = smov [#allocation8]  }
  0x71   : > { %v490_v21 = vadd.f32 %v457_v11, %v456_v10  ;;  %485 = vadd.xlane.f32.xlu0 %v484_v15  ;;  %v493_v25 = vadd.f32 %v459_v17, %v458_v16  ;;  %v463_v27 = vmul.f32 %v3355_v20, %v3355_v20  ;;  %v3372_v30 = vld [vmem:[%s3295_s30 + $0x70] sm:$0xff]  ;;  %v3375_v31 = vld [vmem:[%s3295_s30 + $0x78] sm:$0xff]  ;;  %v464_v33 = vmul.f32 %v3366_v28, %v3366_v28  ;;  %v3382_v35 = vld [vmem:[%s3295_s30 + $0x80] sm:$0xff]  ;;  %p2942_p1 = pnand %p2941_p11, %p4317_p0  ;;  %s2944_s25 = sshll.u32 %s3052_s13, 4  ;;  %s2945_s25 = int_to_ptr.vmem [resolvable:$false] %s2944_s25 }
  0x72   : > { %v496_v32 = vadd.f32 %v461_v24, %v460_v23  ;;  %v465_v34 = vmul.f32 %v3369_v29, %v3369_v29  ;;  %v3385_v36 = vld [vmem:[%s3295_s30 + $0x88] sm:$0xff]  ;;  %v466_v38 = vmul.f32 %v3372_v30, %v3372_v30  ;;  %v467_v39 = vmul.f32 %v3375_v31, %v3375_v31  ;;  %v3392_v40 = vld [vmem:[%s3295_s30 + $0x90] sm:$0xff]  ;;  %v3395_v41 = vld [vmem:[%s3295_s30 + $0x98] sm:$0xff]  ;;  %s2946_s29 = scalar_lea.vmem %s2945_s25, 8192  ;;  %p2947_p5 = scmp.lt.s32.totalorder %s4089_s18, %s2945_s25 }
  0x73   : > { %491 = vadd.xlane.f32.xlu1 %v490_v21  ;;  %v499_v37 = vadd.f32 %v463_v27, %v462_v26  ;;  %v661_v42 = vld [vmem:[#allocation5 + $0x80] sm:$0xff]  ;;  %v662_v43 = vld [vmem:[#allocation5 + $0x88] sm:$0xff]  ;;  %v468_v46 = vmul.f32 %v3382_v35, %v3382_v35  ;;  %v663_v48 = vld [vmem:[#allocation5 + $0x90] sm:$0xff]  ;;  %v469_v52 = vmul.f32 %v3385_v36, %v3385_v36  ;;  %v470_v59 = vmul.f32 %v3392_v40, %v3392_v40  ;;  %p2943_p3 = pneg %p2942_p1  ;;  %p2948_p9 = scmp.lt.s32.totalorder %s2946_s29, %s2940_s21 }
  0x74   : > { %v645_v44 = vld [vmem:[#allocation5] sm:$0xff]  ;;  %v646_v45 = vld [vmem:[#allocation5 + $0x8] sm:$0xff]  ;;  %v2391_v47 = vpack.c.bf16 %v662_v43, %v661_v42  ;;  %v664_v49 = vld [vmem:[#allocation5 + $0x98] sm:$0xff]  ;;  %v502_v51 = vadd.f32 %v465_v34, %v464_v33  ;;  %v505_v58 = vadd.f32 %v467_v39, %v466_v38  ;;  %v471_v60 = vmul.f32 %v3395_v41, %v3395_v41 }
  0x75   : > { %488 = vadd.xlane.f32.xlu0 %v487_v22  ;;  %v647_v50 = vld [vmem:[#allocation5 + $0x10] sm:$0xff]  ;;  %v2393_v53 = vpack.c.bf16 %v646_v45, %v645_v44  ;;  %v2395_v54 = vpack.c.bf16 %v664_v49, %v663_v48  ;;  %v648_v55 = vld [vmem:[#allocation5 + $0x18] sm:$0xff]  ;;  %v665_v56 = vld [vmem:[#allocation5 + $0xa0] sm:$0xff]  ;;  %v508_v11 = vadd.f32 %v469_v52, %v468_v46  ;;  %p2949_p12 = por %p2948_p9, %p2947_p5 }
  0x76   : > { %v666_v57 = vld [vmem:[#allocation5 + $0xa8] sm:$0xff]  ;;  %v3406_v61 = vld [vmem:[%s3295_s30 + $0xa0] sm:$0xff]  ;;  %2392 = vmatprep.subr.bf16.mxu0 %v2391_v47  ;;  %v3412_v63 = vld [vmem:[%s3295_s30 + $0xb0] sm:$0xff]  ;;  %v2397_v4 = vpack.c.bf16 %v648_v55, %v647_v50  ;;  %2503 = vmatprep.subr.bf16.mxu1 %v2391_v47  ;;  %v511_v22 = vadd.f32 %v471_v60, %v470_v59 }
  0x77   : > { %494 = vadd.xlane.f32.xlu1 %v493_v25  ;;  %v3409_v62 = vld [vmem:[%s3295_s30 + $0xa8] sm:$0xff]  ;;  %v3415_v3 = vld [vmem:[%s3295_s30 + $0xb8] sm:$0xff]  ;;  %2394 = vmatpush3.bf16.msra.mxu0 %v2393_v53  ;;  %v2399_v6 = vpack.c.bf16 %v666_v57, %v665_v56  ;;  %v649_v9 = vld [vmem:[#allocation5 + $0x20] sm:$0xff]  ;;  %v472_v15 = vmul.f32 %v3406_v61, %v3406_v61  ;;  %v474_v23 = vmul.f32 %v3412_v63, %v3412_v63  ;;  %p2950_p2 = pnand %p2949_p12, %p2943_p3 }
  0x78   : > { %2396 = vmatprep.subr.bf16.mxu0 %v2395_v54  ;;  %v650_v10 = vld [vmem:[#allocation5 + $0x28] sm:$0xff]  ;;  %2511 = vmatpush3.bf16.msra.mxu1 %v2393_v53  ;;  %v473_v16 = vmul.f32 %v3409_v62, %v3409_v62  ;;  %v667_v17 = vld [vmem:[#allocation5 + $0xb0] sm:$0xff]  ;;  %v668_v21 = vld [vmem:[#allocation5 + $0xb8] sm:$0xff]  ;;  %v475_v24 = vmul.f32 %v3415_v3, %v3415_v3 }
  0x79   : > { %497 = vadd.xlane.f32.xlu0 %v496_v32  ;;  %2504 = vmatprep.subr.bf16.mxu1 %v2395_v54  ;;  %v3426_v25 = vld [vmem:[%s3295_s30 + $0xc0] sm:$0xff]  ;;  %v3429_v26 = vld [vmem:[%s3295_s30 + $0xc8] sm:$0xff]  ;;  %v3432_v27 = vld [vmem:[%s3295_s30 + $0xd0] sm:$0xff]  ;;  %v2401_v33 = vpack.c.bf16 %v650_v10, %v649_v9  ;;  %v2403_v34 = vpack.c.bf16 %v668_v21, %v667_v17 }
  0x7a   : > { %v3435_v32 = vld [vmem:[%s3295_s30 + $0xd8] sm:$0xff]  ;;  %v514_v39 = vadd.f32 %v473_v16, %v472_v15  ;;  %v476_v42 = vmul.f32 %v3426_v25, %v3426_v25  ;;  %v477_v43 = vmul.f32 %v3429_v26, %v3429_v26  ;;  %v669_v44 = vld [vmem:[#allocation5 + $0xc0] sm:$0xff]  ;;  %v670_v45 = vld [vmem:[#allocation5 + $0xc8] sm:$0xff]  ;;  %v517_v46 = vadd.f32 %v475_v24, %v474_v23 }
  0x7b   : > { %500 = vadd.xlane.f32.xlu1 %v499_v37  ;;  %2398 = vmatpush3.bf16.msra.mxu0 %v2397_v4  ;;  %v651_v37 = vld [vmem:[#allocation5 + $0x30] sm:$0xff]  ;;  %v652_v38 = vld [vmem:[#allocation5 + $0x38] sm:$0xff]  ;;  %v478_v47 = vmul.f32 %v3432_v27, %v3432_v27  ;;  %v479_v48 = vmul.f32 %v3435_v32, %v3435_v32  ;;  %v3446_v49 = vld [vmem:[%s3295_s30 + $0xe0] sm:$0xff]  ;;  %v2407_v54 = vpack.c.bf16 %v670_v45, %v669_v44 }
  0x7c   : > { %2400 = vmatprep.subr.bf16.mxu0 %v2399_v6  ;;  %2512 = vmatpush3.bf16.msra.mxu1 %v2397_v4  ;;  %v3449_v50 = vld [vmem:[%s3295_s30 + $0xe8] sm:$0xff]  ;;  %v3455_v52 = vld [vmem:[%s3295_s30 + $0xf8] sm:$0xff]  ;;  %v2405_v53 = vpack.c.bf16 %v652_v38, %v651_v37  ;;  %v653_v55 = vld [vmem:[#allocation5 + $0x40] sm:$0xff]  ;;  %v520_v57 = vadd.f32 %v477_v43, %v476_v42 }
  0x7d   : > { %503 = vadd.xlane.f32.xlu0 %v502_v51  ;;  %2505 = vmatprep.subr.bf16.mxu1 %v2399_v6  ;;  %v3452_v51 = vld [vmem:[%s3295_s30 + $0xf0] sm:$0xff]  ;;  %v654_v56 = vld [vmem:[#allocation5 + $0x48] sm:$0xff]  ;;  %v481_v59 = vmul.f32 %v3449_v50, %v3449_v50  ;;  %v672_v4 = vld [vmem:[#allocation5 + $0xd8] sm:$0xff]  ;;  %v523_v6 = vadd.f32 %v479_v48, %v478_v47  ;;  %v483_v10 = vmul.f32 %v3455_v52, %v3455_v52 }
  0x7e   : > { %v671_v60 = vld [vmem:[#allocation5 + $0xd0] sm:$0xff]  ;;  %v482_v9 = vmul.f32 %v3452_v51, %v3452_v51  ;;  %v656_v17 = vld [vmem:[#allocation5 + $0x58] sm:$0xff]  ;;  %v674_v23 = vld [vmem:[#allocation5 + $0xe8] sm:$0xff] }
  0x7f   : > { %506 = vadd.xlane.f32.xlu1 %v505_v58  ;;  %2402 = vmatpush3.bf16.msra.mxu0 %v2401_v33  ;;  %v480_v58 = vmul.f32 %v3446_v49, %v3446_v49  ;;  %v2411_v15 = vpack.c.bf16 %v672_v4, %v671_v60  ;;  %v655_v16 = vld [vmem:[#allocation5 + $0x50] sm:$0xff]  ;;  %v657_v37 = vld [vmem:[#allocation5 + $0x60] sm:$0xff]  ;;  %v658_v38 = vld [vmem:[#allocation5 + $0x68] sm:$0xff] }
  0x80   : > { %2404 = vmatprep.subr.bf16.mxu0 %v2403_v34  ;;  %2513 = vmatpush3.bf16.msra.mxu1 %v2401_v33  ;;  %v529_v24 = vadd.f32 %v483_v10, %v482_v9  ;;  %v2413_v33 = vpack.c.bf16 %v656_v17, %v655_v16  ;;  %v676_v42 = vld [vmem:[#allocation5 + $0xf8] sm:$0xff]  ;;  %v2417_v43 = vpack.c.bf16 %v658_v38, %v657_v37  ;;  %v659_v45 = vld [vmem:[#allocation5 + $0x70] sm:$0xff]  ;;  %v845_v48 = vld [vmem:[%s4288_s3] sm:$0xff] }
  0x81   : > { %509 = vadd.xlane.f32.xlu0 %v508_v11  ;;  %2506 = vmatprep.subr.bf16.mxu1 %v2403_v34  ;;  %v2409_v11 = vpack.c.bf16 %v654_v56, %v653_v55  ;;  %v526_v21 = vadd.f32 %v481_v59, %v480_v58 }
  0x83   : > { %512 = vadd.xlane.f32.xlu1 %v511_v22  ;;  %2406 = vmatpush3.bf16.msra.mxu0 %v2405_v53  ;;  %v673_v22 = vld [vmem:[#allocation5 + $0xe0] sm:$0xff] }
  0x84   : > { %2408 = vmatprep.subr.bf16.mxu0 %v2407_v54  ;;  %2514 = vmatpush3.bf16.msra.mxu1 %v2405_v53  ;;  %v2415_v34 = vpack.c.bf16 %v674_v23, %v673_v22  ;;  %v846_v53 = vld [vmem:[%s4288_s3 + $0x8] sm:$0xff] }
  0x85   : > { %515 = vadd.xlane.f32.xlu0 %v514_v39  ;;  %2507 = vmatprep.subr.bf16.mxu1 %v2407_v54  ;;  %v675_v39 = vld [vmem:[#allocation5 + $0xf0] sm:$0xff]  ;;  %v3471_v54 = vpack.c.bf16 %v846_v53, %v845_v48 }
  0x86   : > { %v2419_v44 = vpack.c.bf16 %v676_v42, %v675_v39 }
  0x87   : > { %518 = vadd.xlane.f32.xlu1 %v517_v46  ;;  %2410 = vmatpush3.bf16.msra.mxu0 %v2409_v11  ;;  %v660_v46 = vld [vmem:[#allocation5 + $0x78] sm:$0xff] }
  0x88   : > { %2412 = vmatprep.subr.bf16.mxu0 %v2411_v15  ;;  %2515 = vmatpush3.bf16.msra.mxu1 %v2409_v11  ;;  %v2421_v47 = vpack.c.bf16 %v660_v46, %v659_v45 }
  0x89   : > { %521 = vadd.xlane.f32.xlu0 %v520_v57  ;;  %2508 = vmatprep.subr.bf16.mxu1 %v2411_v15 }
  0x8b   : > { %524 = vadd.xlane.f32.xlu1 %v523_v6  ;;  %2414 = vmatpush3.bf16.msra.mxu0 %v2413_v33 }
  0x8c   : > { %2416 = vmatprep.subr.bf16.mxu0 %v2415_v34  ;;  %2516 = vmatpush3.bf16.msra.mxu1 %v2413_v33 }
  0x8d   : > { %527 = vadd.xlane.f32.xlu0 %v526_v21  ;;  %2509 = vmatprep.subr.bf16.mxu1 %v2415_v34 }
  0x8f   : > { %530 = vadd.xlane.f32.xlu1 %v529_v24  ;;  %2418 = vmatpush3.bf16.msra.mxu0 %v2417_v43 }
  0x90   : > { %2420 = vmatprep.subr.bf16.mxu0 %v2419_v44  ;;  %2517 = vmatpush3.bf16.msra.mxu1 %v2417_v43 }
  0x91   : > { %2510 = vmatprep.subr.bf16.mxu1 %v2419_v44 }
  0x93   : > { %2422 = vmatpush3.bf16.msra.mxu0 %v2421_v47 }
  0x94   : > { %2518 = vmatpush3.bf16.msra.mxu1 %v2421_v47 }
  0x95   : > { %2424 = vmatprep.subr.bf16.mxu1 %v3471_v54 }
  0xfe   : > { %v486_v55 = vpop.xlane.xlu0 %485 }
  0xff   : > { %v580_v56 = vmax.f32 %v486_v55, 1e-24 }
 0x100   : > { %v492_v57 = vpop.xlane.xlu1 %491 }
 0x101   : > { %v582_v58 = vmax.f32 %v492_v57, 1e-24  ;;  %2598 = vrsqrt.f32 %v580_v56 }
 0x102   : > { %v489_v59 = vpop.xlane.xlu0 %488 }
 0x103   : > { %v581_v60 = vmax.f32 %v489_v59, 1e-24  ;;  %2600 = vrsqrt.f32 %v582_v58 }
 0x104   : > { %v495_v4 = vpop.xlane.xlu1 %494 }
 0x105   : > { %v583_v6 = vmax.f32 %v495_v4, 1e-24  ;;  %2602 = vrsqrt.f32 %v581_v60 }
 0x106   : > { %v498_v9 = vpop.xlane.xlu0 %497 }
 0x107   : > { %2604 = vrsqrt.f32 %v583_v6  ;;  %v584_v10 = vmax.f32 %v498_v9, 1e-24  ;;  %v847_v6 = vld [vmem:[%s4288_s3 + $0x10] sm:$0xff] }
 0x108   : > { %v501_v11 = vpop.xlane.xlu1 %500 }
 0x109   : > { %2606 = vrsqrt.f32 %v584_v10  ;;  %v585_v17 = vmax.f32 %v501_v11, 1e-24 }
 0x10a   : > { %v504_v15 = vpop.xlane.xlu0 %503 }
 0x10b   : > { %v2599_v16 = vpop.eup %2598  ;;  %2608 = vrsqrt.f32 %v585_v17  ;;  %v586_v37 = vmax.f32 %v504_v15, 1e-24 }
 0x10c   : > { %v507_v21 = vpop.xlane.xlu1 %506  ;;  %v613_v22 = vmul.f32 %v2599_v16, %v3309_v1  ;;  %v612_v23 = vmul.f32 %v2599_v16, %v3306_v0 }
 0x10d   : > { %v2601_v24 = vpop.eup %2600  ;;  %v587_v0 = vmax.f32 %v507_v21, 1e-24 }
 0x10e   : > { %747 = vmatprep.mubr.f32.mxu0 %v613_v22  ;;  %v510_v33 = vpop.xlane.xlu0 %509  ;;  %v617_v44 = vmul.f32 %v2601_v24, %v3327_v8  ;;  %v616_v47 = vmul.f32 %v2601_v24, %v3324_v7 }
 0x10f   : > { %v2603_v34 = vpop.eup %2602  ;;  %748 = vmatmul.mubr.f32.vlgmr.msra.gmra.mrb[0].mxu0 %v612_v23  ;;  %v588_v38 = vmax.f32 %v510_v33, 1e-24 }
 0x110   : > { %v513_v39 = vpop.xlane.xlu1 %512  ;;  %v615_v42 = vmul.f32 %v2603_v34, %v3319_v5  ;;  %v614_v43 = vmul.f32 %v2603_v34, %v3312_v2 }
 0x111   : > { %v589_v45 = vmax.f32 %v513_v39, 1e-24  ;;  %v2605_v46 = vpop.eup %2604  ;;  %2610 = vrsqrt.f32 %v588_v38 }
 0x112   : > { %752 = vmatprep.mubr.f32.mxu0 %v615_v42  ;;  %v516_v1 = vpop.xlane.xlu0 %515  ;;  %v619_v5 = vmul.f32 %v2605_v46, %v3339_v13  ;;  %v618_v56 = vmul.f32 %v2605_v46, %v3336_v12  ;;  %v848_v12 = vld [vmem:[%s4288_s3 + $0x18] sm:$0xff] }
 0x113   : > { %2612 = vrsqrt.f32 %v589_v45  ;;  %753 = vmatmul.mubr.f32.gmra.mrb[2].mxu0 %v614_v43  ;;  %v590_v48 = vmax.f32 %v516_v1, 1e-24  ;;  %v2607_v2 = vpop.eup %2606  ;;  %v2427_v17 = vpack.c.bf16 %v848_v12, %v847_v6  ;;  %v856_v1 = vld [vmem:[%s4288_s3 + $0x58] sm:$0xff] }
 0x114   : > { %2614 = vrsqrt.f32 %v586_v37  ;;  %v519_v53 = vpop.xlane.xlu1 %518  ;;  %757 = vmatprep.mubr.f32.mxu0 %v617_v44  ;;  %v621_v58 = vmul.f32 %v2607_v2, %v3349_v18  ;;  %v620_v4 = vmul.f32 %v2607_v2, %v3342_v14  ;;  %v860_v2 = vld [vmem:[%s4288_s3 + $0x78] sm:$0xff] }
 0x115   : > { %v591_v55 = vmax.f32 %v519_v53, 1e-24  ;;  %2616 = vrsqrt.f32 %v590_v48  ;;  %v2609_v7 = vpop.eup %2608  ;;  %v857_v48 = vld [vmem:[%s4288_s3 + $0x60] sm:$0xff]  ;;  %v858_v53 = vld [vmem:[%s4288_s3 + $0x68] sm:$0xff] }
 0x116   : > { %2618 = vrsqrt.f32 %v587_v0  ;;  %v522_v8 = vpop.xlane.xlu0 %521  ;;  %v623_v18 = vmul.f32 %v2609_v7, %v3355_v20  ;;  %v622_v22 = vmul.f32 %v2609_v7, %v3352_v19  ;;  %v849_v20 = vld [vmem:[%s4288_s3 + $0x20] sm:$0xff]  ;;  %v855_v0 = vld [vmem:[%s4288_s3 + $0x50] sm:$0xff] }
 0x117   : > { %758 = vmatmul.mubr.f32.gmra.mrb[4].mxu0 %v616_v47  ;;  %2620 = vrsqrt.f32 %v591_v55  ;;  %v592_v57 = vmax.f32 %v522_v8, 1e-24  ;;  %v2443_v47 = vpack.c.bf16 %v856_v1, %v855_v0  ;;  %v859_v55 = vld [vmem:[%s4288_s3 + $0x70] sm:$0xff]  ;;  %v3558_v7 = vld [vmem:[%s4287_s2] ss:$0 sm:$0xff] }
 0x118   : > { %762 = vmatprep.mubr.f32.mxu0 %v619_v5  ;;  %v525_v59 = vpop.xlane.xlu1 %524  ;;  %v2447_v5 = vpack.c.bf16 %v858_v53, %v857_v48  ;;  %v2451_v8 = vpack.c.bf16 %v860_v2, %v859_v55 }
 0x119   : > { %2622 = vrsqrt.f32 %v592_v57  ;;  %v593_v13 = vmax.f32 %v525_v59, 1e-24  ;;  %v1030_v57 = vld [vmem:[%s4290_s5 + $0x8] sm:$0xff] }
 0x11a   : > { %v528_v15 = vpop.xlane.xlu0 %527 }
 0x11b   : > { %v2611_v60 = vpop.eup %2610  ;;  %763 = vmatmul.mubr.f32.gmra.mrb[6].mxu0 %v618_v56  ;;  %2624 = vrsqrt.f32 %v593_v13  ;;  %v594_v24 = vmax.f32 %v528_v15, 1e-24  ;;  %v1029_v56 = vld [vmem:[%s4290_s5] sm:$0xff] }
 0x11c   : > { %767 = vmatprep.mubr.f32.mxu0 %v621_v58  ;;  %v629_v10 = vmul.f32 %v2611_v60, %v3385_v36  ;;  %v628_v11 = vmul.f32 %v2611_v60, %v3382_v35  ;;  %v850_v35 = vld [vmem:[%s4288_s3 + $0x28] sm:$0xff]  ;;  %v531_v33 = vpop.xlane.xlu1 %530  ;;  %v2455_v58 = vpack.c.bf16 %v1030_v57, %v1029_v56 }
 0x11d   : > { %v2613_v9 = vpop.eup %2612  ;;  %2626 = vrsqrt.f32 %v594_v24  ;;  %v595_v39 = vmax.f32 %v531_v33, 1e-24 }
 0x11e   : > { %v2615_v14 = vpop.eup %2614  ;;  %v631_v16 = vmul.f32 %v2613_v9, %v3395_v41  ;;  %787 = vmatprep.mubr.f32.mxu1 %v629_v10  ;;  %v630_v23 = vmul.f32 %v2613_v9, %v3392_v40  ;;  %v2431_v40 = vpack.c.bf16 %v850_v35, %v849_v20  ;;  %v1031_v35 = vld [vmem:[%s4290_s5 + $0x10] sm:$0xff] }
 0x11f   : > { %v2617_v21 = vpop.eup %2616  ;;  %768 = vmatmul.mubr.f32.gmra.mrb[8].mxu0 %v620_v4  ;;  %788 = vmatmul.mubr.f32.vlgmr.msra.gmra.mrb[0].mxu1 %v628_v11  ;;  %v625_v41 = vmul.f32 %v2615_v14, %v3369_v29  ;;  %v624_v37 = vmul.f32 %v2615_v14, %v3366_v28  ;;  %2628 = vrsqrt.f32 %v595_v39 }
 0x120   : > { %v2619_v36 = vpop.eup %2618  ;;  %772 = vmatprep.mubr.f32.mxu0 %v623_v18  ;;  %792 = vmatprep.mubr.f32.mxu1 %v631_v16  ;;  %v633_v19 = vmul.f32 %v2617_v21, %v3409_v62  ;;  %v632_v38 = vmul.f32 %v2617_v21, %v3406_v61 }
 0x121   : > { %v2621_v34 = vpop.eup %2620  ;;  %2426 = vmatpush3.bf16.msra.mxu1 %v3471_v54  ;;  %v627_v29 = vmul.f32 %v2619_v36, %v3375_v31  ;;  %v626_v54 = vmul.f32 %v2619_v36, %v3372_v30  ;;  %v1032_v36 = vld [vmem:[%s4290_s5 + $0x18] sm:$0xff] }
 0x122   : > { %2428 = vmatprep.subr.bf16.mxu1 %v2427_v17  ;;  %v635_v62 = vmul.f32 %v2621_v34, %v3415_v3  ;;  %v634_v28 = vmul.f32 %v2621_v34, %v3412_v63 }
 0x123   : > { %773 = vmatmul.mubr.f32.gmra.mrb[10].mxu0 %v622_v22  ;;  %793 = vmatmul.mubr.f32.gmra.mrb[2].mxu1 %v630_v23  ;;  %v2623_v42 = vpop.eup %2622 }
 0x124   : > { %777 = vmatprep.mubr.f32.mxu0 %v625_v41  ;;  %797 = vmatprep.mubr.f32.mxu1 %v633_v19  ;;  %v637_v61 = vmul.f32 %v2623_v42, %v3429_v26  ;;  %v636_v31 = vmul.f32 %v2623_v42, %v3426_v25  ;;  %v1034_v42 = vld [vmem:[%s4290_s5 + $0x28] sm:$0xff] }
 0x125   : > { %2430 = vmatpush3.bf16.msra.mxu1 %v2427_v17  ;;  %v2625_v43 = vpop.eup %2624 }
 0x126   : > { %2432 = vmatprep.subr.bf16.mxu1 %v2431_v40  ;;  %v639_v3 = vmul.f32 %v2625_v43, %v3435_v32  ;;  %v638_v30 = vmul.f32 %v2625_v43, %v3432_v27  ;;  %v851_v32 = vld [vmem:[%s4288_s3 + $0x30] sm:$0xff]  ;;  %v852_v27 = vld [vmem:[%s4288_s3 + $0x38] sm:$0xff] }
 0x127   : > { %778 = vmatmul.mubr.f32.gmra.mrb[12].mxu0 %v624_v37  ;;  %798 = vmatmul.mubr.f32.gmra.mrb[4].mxu1 %v632_v38  ;;  %v2627_v44 = vpop.eup %2626 }
 0x128   : > { %782 = vmatprep.mubr.f32.mxu0 %v627_v29  ;;  %802 = vmatprep.mubr.f32.mxu1 %v635_v62  ;;  %v641_v63 = vmul.f32 %v2627_v44, %v3449_v50  ;;  %v640_v26 = vmul.f32 %v2627_v44, %v3446_v49  ;;  %v2435_v50 = vpack.c.bf16 %v852_v27, %v851_v32  ;;  %v853_v49 = vld [vmem:[%s4288_s3 + $0x40] sm:$0xff] }
 0x129   : > { %2434 = vmatpush3.bf16.msra.mxu1 %v2431_v40  ;;  %v2629_v45 = vpop.eup %2628  ;;  %v2459_v40 = vpack.c.bf16 %v1032_v36, %v1031_v35  ;;  %v1033_v62 = vld [vmem:[%s4290_s5 + $0x20] sm:$0xff] }
 0x12a   : > { %v643_v46 = vmul.f32 %v2629_v45, %v3455_v52  ;;  %v642_v25 = vmul.f32 %v2629_v45, %v3452_v51  ;;  %2436 = vmatprep.subr.bf16.mxu1 %v2435_v50  ;;  %v854_v51 = vld [vmem:[%s4288_s3 + $0x48] sm:$0xff] }
 0x12b   : > { %783 = vmatmul.mubr.f32.gmra.mrb[14].mxu0 %v626_v54  ;;  %803 = vmatmul.mubr.f32.gmra.mrb[6].mxu1 %v634_v28  ;;  %v2439_v52 = vpack.c.bf16 %v854_v51, %v853_v49 }
 0x12c   : > { %807 = vmatprep.mubr.f32.mxu1 %v637_v61 }
 0x12d   : > { %2438 = vmatpush3.bf16.msra.mxu1 %v2435_v50 }
 0x12e   : > { %2440 = vmatprep.subr.bf16.mxu1 %v2439_v52 }
 0x12f   : > { %808 = vmatmul.mubr.f32.gmra.mrb[8].mxu1 %v636_v31  ;;  %v2463_v31 = vpack.c.bf16 %v1034_v42, %v1033_v62  ;;  %v1259_v62 = vld [vmem:[#allocation7 + $0x28] sm:$0xff]  ;;  %v1261_v42 = vld [vmem:[#allocation7 + $0x38] sm:$0xff] }
 0x130   : > { %812 = vmatprep.mubr.f32.mxu1 %v639_v3 }
 0x131   : > { %2442 = vmatpush3.bf16.msra.mxu1 %v2439_v52 }
 0x132   : > { %2444 = vmatprep.subr.bf16.mxu1 %v2443_v47 }
 0x133   : > { %813 = vmatmul.mubr.f32.gmra.mrb[10].mxu1 %v638_v30 }
 0x134   : > { %817 = vmatprep.mubr.f32.mxu1 %v641_v63 }
 0x135   : > { %2446 = vmatpush3.bf16.msra.mxu1 %v2443_v47 }
 0x136   : > { %2448 = vmatprep.subr.bf16.mxu1 %v2447_v5 }
 0x137   : > { %818 = vmatmul.mubr.f32.gmra.mrb[12].mxu1 %v640_v26 }
 0x138   : > { %822 = vmatprep.mubr.f32.mxu1 %v643_v46 }
 0x139   : > { %2450 = vmatpush3.bf16.msra.mxu1 %v2447_v5 }
 0x13a   : > { %2452 = vmatprep.subr.bf16.mxu1 %v2451_v8 }
 0x13b   : > { %823 = vmatmul.mubr.f32.gmra.mrb[14].mxu1 %v642_v25 }
 0x13d   : > { %2454 = vmatpush3.bf16.msra.mxu1 %v2451_v8 }
 0x13e   : > { %2456 = vmatprep.subr.bf16.mxu1 %v2455_v58 }
 0x1e2   : > { %v2191_v59 = vpop.f32.mrb[0].mxu0 }
 0x1e3   : > { %v2192_v60 = vpop.f32.mrb[1].mxu0 }
 0x1e4   : > { %v2193_v4 = vadd.f32 %v2192_v60, %v2191_v59 }
 0x1e6   : > { %v750_v13 = vadd.f32 %v2193_v4, %v3558_v7  ;;  %v2194_v6 = vpop.f32.mrb[2].mxu0 }
 0x1e7   : > { %v2195_v12 = vpop.f32.mrb[3].mxu0 }
 0x1e8   : > { %2630 = vtanh.f32 %v750_v13  ;;  %v2196_v9 = vadd.f32 %v2195_v12, %v2194_v6 }
 0x1ea   : > { %v755_v18 = vadd.f32 %v2196_v9, %v3558_v7  ;;  %v2197_v10 = vpop.f32.mrb[4].mxu0 }
 0x1eb   : > { %v2198_v11 = vpop.f32.mrb[5].mxu0 }
 0x1ec   : > { %2632 = vtanh.f32 %v755_v18  ;;  %v2199_v15 = vadd.f32 %v2198_v11, %v2197_v10 }
 0x1ee   : > { %v760_v14 = vadd.f32 %v2199_v15, %v3558_v7  ;;  %v2200_v16 = vpop.f32.mrb[6].mxu0 }
 0x1ef   : > { %v2201_v17 = vpop.f32.mrb[7].mxu0 }
 0x1f0   : > { %2634 = vtanh.f32 %v760_v14  ;;  %v2202_v21 = vadd.f32 %v2201_v17, %v2200_v16 }
 0x1f2   : > { %v2631_v22 = vpop.eup %2630  ;;  %v765_v23 = vadd.f32 %v2202_v21, %v3558_v7  ;;  %v2203_v24 = vpop.f32.mrb[8].mxu0 }
 0x1f3   : > { %v2215_v20 = vpop.f32.mrb[0].mxu1  ;;  %v2204_v41 = vpop.f32.mrb[9].mxu0  ;;  %2327 = vmatprep.mubr.f32.mxu1 %v2631_v22 }
 0x1f4   : > { %v2216_v19 = vpop.f32.mrb[1].mxu1  ;;  %2636 = vtanh.f32 %v765_v23  ;;  %v2205_v33 = vadd.f32 %v2204_v41, %v2203_v24 }
 0x1f5   : > { %v2217_v34 = vadd.f32 %v2216_v19, %v2215_v20 }
 0x1f6   : > { %v2633_v37 = vpop.eup %2632  ;;  %v770_v38 = vadd.f32 %v2205_v33, %v3558_v7  ;;  %v2206_v39 = vpop.f32.mrb[10].mxu0  ;;  %v1035_v33 = vld [vmem:[%s4290_s5 + $0x30] sm:$0xff] }
 0x1f7   : > { %v2218_v29 = vpop.f32.mrb[2].mxu1  ;;  %v2207_v54 = vpop.f32.mrb[11].mxu0  ;;  %2328 = vmatmul.mubr.f32.vlgmr.msra.gmra.mrb[16].mxu1 %v2633_v37  ;;  %v790_v52 = vadd.f32 %v2217_v34, %v3558_v7  ;;  %v1257_v37 = vld [vmem:[#allocation7 + $0x18] sm:$0xff] }
 0x1f8   : > { %v2219_v28 = vpop.f32.mrb[3].mxu1  ;;  %2638 = vtanh.f32 %v770_v38  ;;  %v2208_v61 = vadd.f32 %v2207_v54, %v2206_v39  ;;  %2458 = vmatpush3.bf16.msra.mxu1 %v2455_v58  ;;  %v1254_v38 = vld [vmem:[#allocation7] sm:$0xff] }
 0x1f9   : > { %v2220_v43 = vadd.f32 %v2219_v28, %v2218_v29  ;;  %2460 = vmatprep.subr.bf16.mxu1 %v2459_v40  ;;  %v1256_v29 = vld [vmem:[#allocation7 + $0x10] sm:$0xff]  ;;  %v2475_v28 = vpack.c.bf16 %v1261_v42, %v1259_v62 }
 0x1fa   : > { %v2635_v3 = vpop.eup %2634  ;;  %v775_v44 = vadd.f32 %v2208_v61, %v3558_v7  ;;  %v2209_v30 = vpop.f32.mrb[12].mxu0  ;;  %v2473_v54 = vpack.c.bf16 %v1256_v29, %v1254_v38  ;;  %v1258_v61 = vld [vmem:[#allocation7 + $0x20] sm:$0xff] }
 0x1fb   : > { %v2221_v63 = vpop.f32.mrb[4].mxu1  ;;  %v2210_v45 = vpop.f32.mrb[13].mxu0  ;;  %2330 = vmatprep.mubr.f32.mxu1 %v2635_v3  ;;  %v795_v5 = vadd.f32 %v2220_v43, %v3558_v7  ;;  %v1260_v43 = vld [vmem:[#allocation7 + $0x30] sm:$0xff]  ;;  %v1265_v3 = vld [vmem:[#allocation7 + $0x58] sm:$0xff] }
 0x1fc   : > { %v2222_v26 = vpop.f32.mrb[5].mxu1  ;;  %2640 = vtanh.f32 %v775_v44  ;;  %v2211_v46 = vadd.f32 %v2210_v45, %v2209_v30  ;;  %2462 = vmatpush3.bf16.msra.mxu1 %v2459_v40  ;;  %v1255_v40 = vld [vmem:[#allocation7 + $0x8] sm:$0xff]  ;;  %v2477_v44 = vpack.c.bf16 %v1260_v43, %v1258_v61  ;;  %v1264_v45 = vld [vmem:[#allocation7 + $0x50] sm:$0xff] }
 0x1fd   : > { %v2223_v25 = vadd.f32 %v2222_v26, %v2221_v63  ;;  %2464 = vmatprep.subr.bf16.mxu1 %v2463_v31  ;;  %v2471_v39 = vpack.c.bf16 %v1257_v37, %v1255_v40  ;;  %v1262_v63 = vld [vmem:[#allocation7 + $0x40] sm:$0xff]  ;;  %v1267_v26 = vld [vmem:[#allocation7 + $0x68] sm:$0xff] }
 0x1fe   : > { %v2637_v32 = vpop.eup %2636  ;;  %v780_v27 = vadd.f32 %v2211_v46, %v3558_v7  ;;  %v2212_v50 = vpop.f32.mrb[14].mxu0  ;;  %v1269_v46 = vld [vmem:[#allocation7 + $0x78] sm:$0xff] }
 0x1ff   : > { %v2224_v49 = vpop.f32.mrb[6].mxu1  ;;  %v2213_v51 = vpop.f32.mrb[15].mxu0  ;;  %2331 = vmatmul.mubr.f32.gmra.mrb[18].mxu1 %v2637_v32  ;;  %v800_v2 = vadd.f32 %v2223_v25, %v3558_v7  ;;  %2472 = vmatprep.subr.bf16.mxu0 %v2471_v39  ;;  %v2481_v25 = vpack.c.bf16 %v1264_v45, %v1262_v63  ;;  %v2483_v32 = vpack.c.bf16 %v1269_v46, %v1267_v26  ;;  %v1275_v63 = vld [vmem:[#allocation7 + $0xa8] sm:$0xff]  ;;  %v1277_v45 = vld [vmem:[#allocation7 + $0xb8] sm:$0xff]  ;;  %v1274_v46 = vld [vmem:[#allocation7 + $0xa0] sm:$0xff] }
 0x200   : > { %v2225_v0 = vpop.f32.mrb[7].mxu1  ;;  %2642 = vtanh.f32 %v780_v27  ;;  %v2214_v1 = vadd.f32 %v2213_v51, %v2212_v50  ;;  %2466 = vmatpush3.bf16.msra.mxu1 %v2463_v31  ;;  %v1263_v31 = vld [vmem:[#allocation7 + $0x48] sm:$0xff]  ;;  %2474 = vmatpush1.bf16.msra.mxu0 %v2473_v54  ;;  %v1266_v27 = vld [vmem:[#allocation7 + $0x60] sm:$0xff]  ;;  %v1268_v50 = vld [vmem:[#allocation7 + $0x70] sm:$0xff]  ;;  %v2491_v26 = vpack.c.bf16 %v1277_v45, %v1275_v63 }
 0x201   : > { %v2226_v47 = vadd.f32 %v2225_v0, %v2224_v49  ;;  %2644 = vtanh.f32 %v790_v52  ;;  %2476 = vmatprep.subr.bf16.mxu0 %v2475_v28  ;;  %v2479_v30 = vpack.c.bf16 %v1265_v3, %v1263_v31  ;;  %v1271_v49 = vld [vmem:[#allocation7 + $0x88] sm:$0xff]  ;;  %v1273_v51 = vld [vmem:[#allocation7 + $0x98] sm:$0xff]  ;;  %v2485_v52 = vpack.c.bf16 %v1268_v50, %v1266_v27 }
 0x202   : > { %v2639_v48 = vpop.eup %2638  ;;  %v785_v53 = vadd.f32 %v2214_v1, %v3558_v7  ;;  %v2227_v55 = vpop.f32.mrb[8].mxu1  ;;  %v2487_v0 = vpack.c.bf16 %v1273_v51, %v1271_v49  ;;  %v1270_v1 = vld [vmem:[#allocation7 + $0x80] sm:$0xff]  ;;  %v1279_v27 = vld [vmem:[#allocation7 + $0xc8] sm:$0xff]  ;;  %v1281_v50 = vld [vmem:[#allocation7 + $0xd8] sm:$0xff] }
 0x203   : > { %2333 = vmatprep.mubr.f32.mxu1 %v2639_v48  ;;  %v2228_v8 = vpop.f32.mrb[9].mxu1  ;;  %v805_v58 = vadd.f32 %v2226_v47, %v3558_v7  ;;  %v1272_v47 = vld [vmem:[#allocation7 + $0x90] sm:$0xff]  ;;  %v1278_v49 = vld [vmem:[#allocation7 + $0xc0] sm:$0xff]  ;;  %v2495_v51 = vpack.c.bf16 %v1281_v50, %v1279_v27 }
 0x204   : > { %2646 = vtanh.f32 %v785_v53  ;;  %v2229_v56 = vadd.f32 %v2228_v8, %v2227_v55  ;;  %2478 = vmatpush1.bf16.msra.mxu0 %v2477_v44  ;;  %v2489_v48 = vpack.c.bf16 %v1272_v47, %v1270_v1  ;;  %v3597_v53 = vld [vmem:[%s4289_s4] ss:$0 sm:$0xff]  ;;  %v1283_v1 = vld [vmem:[#allocation7 + $0xe8] sm:$0xff]  ;;  %v1285_v47 = vld [vmem:[#allocation7 + $0xf8] sm:$0xff] }
 0x205   : > { %2648 = vtanh.f32 %v795_v5  ;;  %2480 = vmatprep.subr.bf16.mxu0 %v2479_v30  ;;  %v1253_v50 = vld [vmem:[%s4293_s8] sm:$0x3] }
 0x206   : > { %v2641_v57 = vpop.eup %2640  ;;  %v2230_v59 = vpop.f32.mrb[10].mxu1  ;;  %2650 = vtanh.f32 %v800_v2  ;;  %v810_v60 = vadd.f32 %v2229_v56, %v3558_v7 }
 0x207   : > { %2334 = vmatmul.mubr.f32.gmra.mrb[20].mxu1 %v2641_v57  ;;  %v2231_v4 = vpop.f32.mrb[11].mxu1  ;;  %2652 = vtanh.f32 %v805_v58 }
 0x208   : > { %v2232_v13 = vadd.f32 %v2231_v4, %v2230_v59  ;;  %2654 = vtanh.f32 %v810_v60  ;;  %2482 = vmatpush1.bf16.msra.mxu0 %v2481_v25  ;;  %v1276_v25 = vld [vmem:[#allocation7 + $0xb0] sm:$0xff] }
 0x209   : > { %2484 = vmatprep.subr.bf16.mxu0 %v2483_v32  ;;  %v2493_v32 = vpack.c.bf16 %v1276_v25, %v1274_v46  ;;  %v1287_v25 = vlaneseq }
 0x20a   : > { %v2643_v6 = vpop.eup %2642  ;;  %v815_v12 = vadd.f32 %v2232_v13, %v3558_v7  ;;  %v2233_v9 = vpop.f32.mrb[12].mxu1 }
 0x20b   : > { %2336 = vmatprep.mubr.f32.mxu1 %v2643_v6  ;;  %v2234_v18 = vpop.f32.mrb[13].mxu1  ;;  %v2645_v11 = vpop.eup %2644 }
 0x20c   : > { %v2235_v10 = vadd.f32 %v2234_v18, %v2233_v9  ;;  %2656 = vtanh.f32 %v815_v12  ;;  %2486 = vmatpush1.bf16.msra.mxu0 %v2485_v52  ;;  %v1280_v52 = vld [vmem:[#allocation7 + $0xd0] sm:$0xff] }
 0x20d   : > { %2488 = vmatprep.subr.bf16.mxu0 %v2487_v0  ;;  %v2497_v0 = vpack.c.bf16 %v1280_v52, %v1278_v49 }
 0x20e   : > { %v2647_v15 = vpop.eup %2646  ;;  %v820_v14 = vadd.f32 %v2235_v10, %v3558_v7  ;;  %v2236_v16 = vpop.f32.mrb[14].mxu1 }
 0x20f   : > { %2337 = vmatmul.mubr.f32.gmra.mrb[22].mxu1 %v2647_v15  ;;  %v2237_v17 = vpop.f32.mrb[15].mxu1  ;;  %v2649_v21 = vpop.eup %2648 }
 0x210   : > { %2339 = vmatprep.mubr.f32.mxu1 %v2645_v11  ;;  %2658 = vtanh.f32 %v820_v14  ;;  %v2238_v22 = vadd.f32 %v2237_v17, %v2236_v16  ;;  %v2651_v23 = vpop.eup %2650  ;;  %2490 = vmatpush1.bf16.msra.mxu0 %v2489_v48  ;;  %v2499_v48 = vpack.c.bf16 %v1285_v47, %v1283_v1 }
 0x211   : > { %v2653_v20 = vpop.eup %2652  ;;  %2492 = vmatprep.subr.bf16.mxu0 %v2491_v26 }
 0x212   : > { %v825_v24 = vadd.f32 %v2238_v22, %v3558_v7  ;;  %v2655_v35 = vpop.eup %2654  ;;  %v1036_v7 = vld [vmem:[%s4290_s5 + $0x38] sm:$0xff] }
 0x213   : > { %2340 = vmatmul.mubr.f32.gmra.mrb[24].mxu1 %v2649_v21  ;;  %v2467_v34 = vpack.c.bf16 %v1036_v7, %v1035_v33 }
 0x214   : > { %2342 = vmatprep.mubr.f32.mxu1 %v2651_v23  ;;  %2660 = vtanh.f32 %v825_v24  ;;  %2494 = vmatpush1.bf16.msra.mxu0 %v2493_v32  ;;  %v3669_v32 = vshrl.u32 %v1287_v25, 7 }
 0x215   : > { %2468 = vmatprep.subr.bf16.mxu1 %v2467_v34  ;;  %2496 = vmatprep.subr.bf16.mxu0 %v2495_v51 }
 0x216   : > { %v2657_v36 = vpop.eup %2656  ;;  %2470 = vmatpush3.bf16.msra.mxu1 %v2467_v34  ;;  %v1289_v27 = vsub.s32 0, %v3669_v32  ;;  %v1293_v49 = vsub.s32 1, %v3669_v32 }
 0x217   : > { %2343 = vmatmul.mubr.f32.gmra.mrb[26].mxu1 %v2653_v20 }
 0x218   : > { %2345 = vmatprep.mubr.f32.mxu1 %v2655_v35  ;;  %2498 = vmatpush1.bf16.msra.mxu0 %v2497_v0  ;;  %v3676_v51 = vrot.slane %v1253_v50, %v1289_v27  ;;  %v3678_v52 = vrot.slane %v1253_v50, %v1293_v49 }
 0x219   : > { %2500 = vmatprep.subr.bf16.mxu0 %v2499_v48 }
 0x21a   : > { %v2659_v41 = vpop.eup %2658 }
 0x21b   : > { %2346 = vmatmul.mubr.f32.gmra.mrb[28].mxu1 %v2657_v36 }
 0x21c   : > { %2348 = vmatprep.mubr.f32.mxu1 %v2659_v41 }
 0x21e   : > { %v2661_v19 = vpop.eup %2660 }
 0x21f   : > { %2349 = vmatmul.mubr.f32.gmra.mrb[30].mxu1 %v2661_v19 }
 0x2ca   : > { %v2329_v5 = vpop.f32.mrb[16].mxu1 }
 0x2cb   : > { %v939_v55 = vadd.f32 %v2329_v5, %v3597_v53  ;;  %v933_v2 = vpop.f32.mrb[17].mxu1  ;;  %v1284_v5 = vld [vmem:[#allocation7 + $0xf0] sm:$0xff] }
 0x2cc   : > { %v934_v8 = vadd.f32 %v3597_v53, %v933_v2  ;;  %v3051_v2 = vmov 0.0  }
 0x2cd   : > { %1361 = vmatprep.mubr.f32.mxu0 %v3051_v2 }
 0x2ce   : > { %2662 = vtanh.f32 %v934_v8  ;;  %v3635_v8 = vld [vmem:[%s4291_s6] ss:$0 sm:$0xff] }
 0x2cf   : > { %2664 = vtanh.f32 %v939_v55 }
 0x2d2   : > { %v2332_v56 = vpop.f32.mrb[18].mxu1 }
 0x2d3   : > { %v949_v57 = vadd.f32 %v2332_v56, %v3597_v53  ;;  %v943_v58 = vpop.f32.mrb[19].mxu1 }
 0x2d4   : > { %v944_v59 = vadd.f32 %v3597_v53, %v943_v58 }
 0x2d6   : > { %2666 = vtanh.f32 %v944_v59 }
 0x2d7   : > { %2668 = vtanh.f32 %v949_v57 }
 0x2d8   : > { %v2663_v60 = vpop.eup %2662 }
 0x2d9   : > { %v2665_v4 = vpop.eup %2664  ;;  %2367 = vmatprep.mubr.msk.f32.mxu1 %vm1043_vm0, %v2663_v60 }
 0x2da   : > { %v2335_v13 = vpop.f32.mrb[20].mxu1  ;;  %2368 = vmatmul.mubr.msk.f32.vlgmr.msra.gmra.mrb[32].mxu1 %vm1043_vm0, %v2665_v4 }
 0x2db   : > { %v959_v6 = vadd.f32 %v2335_v13, %v3597_v53  ;;  %v953_v12 = vpop.f32.mrb[21].mxu1 }
 0x2dc   : > { %v954_v9 = vadd.f32 %v3597_v53, %v953_v12 }
 0x2de   : > { %2670 = vtanh.f32 %v954_v9 }
 0x2df   : > { %2672 = vtanh.f32 %v959_v6 }
 0x2e0   : > { %v2667_v18 = vpop.eup %2666 }
 0x2e1   : > { %v2669_v10 = vpop.eup %2668  ;;  %2370 = vmatprep.mubr.msk.f32.mxu1 %vm1043_vm0, %v2667_v18 }
 0x2e2   : > { %v2338_v11 = vpop.f32.mrb[22].mxu1  ;;  %2371 = vmatmul.mubr.msk.f32.gmra.mrb[34].mxu1 %vm1043_vm0, %v2669_v10 }
 0x2e3   : > { %v969_v15 = vadd.f32 %v2338_v11, %v3597_v53  ;;  %v963_v14 = vpop.f32.mrb[23].mxu1 }
 0x2e4   : > { %v964_v16 = vadd.f32 %v3597_v53, %v963_v14 }
 0x2e6   : > { %2674 = vtanh.f32 %v964_v16  ;;  %v2341_v17 = vpop.f32.mrb[24].mxu1 }
 0x2e7   : > { %2676 = vtanh.f32 %v969_v15  ;;  %v979_v21 = vadd.f32 %v2341_v17, %v3597_v53  ;;  %v973_v22 = vpop.f32.mrb[25].mxu1 }
 0x2e8   : > { %v2671_v23 = vpop.eup %2670  ;;  %v974_v24 = vadd.f32 %v3597_v53, %v973_v22 }
 0x2e9   : > { %v2673_v20 = vpop.eup %2672  ;;  %2678 = vtanh.f32 %v979_v21  ;;  %2373 = vmatprep.mubr.msk.f32.mxu1 %vm1043_vm0, %v2671_v23 }
 0x2ea   : > { %2680 = vtanh.f32 %v974_v24  ;;  %2374 = vmatmul.mubr.msk.f32.gmra.mrb[36].mxu1 %vm1043_vm0, %v2673_v20  ;;  %v2344_v35 = vpop.f32.mrb[26].mxu1 }
 0x2eb   : > { %v989_v36 = vadd.f32 %v2344_v35, %v3597_v53  ;;  %v983_v41 = vpop.f32.mrb[27].mxu1 }
 0x2ec   : > { %v984_v19 = vadd.f32 %v3597_v53, %v983_v41 }
 0x2ed   : > { %2682 = vtanh.f32 %v989_v36 }
 0x2ee   : > { %2684 = vtanh.f32 %v984_v19  ;;  %v2347_v33 = vpop.f32.mrb[28].mxu1 }
 0x2ef   : > { %v999_v7 = vadd.f32 %v2347_v33, %v3597_v53  ;;  %v993_v34 = vpop.f32.mrb[29].mxu1 }
 0x2f0   : > { %v2675_v40 = vpop.eup %2674  ;;  %v994_v37 = vadd.f32 %v3597_v53, %v993_v34 }
 0x2f1   : > { %v2677_v38 = vpop.eup %2676  ;;  %2376 = vmatprep.mubr.msk.f32.mxu1 %vm1043_vm0, %v2675_v40  ;;  %2686 = vtanh.f32 %v999_v7 }
 0x2f2   : > { %2377 = vmatmul.mubr.msk.f32.gmra.mrb[38].mxu1 %vm1043_vm0, %v2677_v38  ;;  %2688 = vtanh.f32 %v994_v37  ;;  %v2350_v39 = vpop.f32.mrb[30].mxu1 }
 0x2f3   : > { %v2679_v29 = vpop.eup %2678  ;;  %v1009_v62 = vadd.f32 %v2350_v39, %v3597_v53  ;;  %v1003_v42 = vpop.f32.mrb[31].mxu1 }
 0x2f4   : > { %v2681_v54 = vpop.eup %2680  ;;  %v1004_v28 = vadd.f32 %v3597_v53, %v1003_v42  ;;  %v1282_v53 = vld [vmem:[#allocation7 + $0xe0] sm:$0xff] }
 0x2f5   : > { %2379 = vmatprep.mubr.msk.f32.mxu1 %vm1043_vm0, %v2681_v54  ;;  %2690 = vtanh.f32 %v1009_v62  ;;  %v2501_v55 = vpack.c.bf16 %v1284_v5, %v1282_v53 }
 0x2f6   : > { %2380 = vmatmul.mubr.msk.f32.gmra.mrb[40].mxu1 %vm1043_vm0, %v2679_v29  ;;  %2692 = vtanh.f32 %v1004_v28 }
 0x2f7   : > { %v2683_v61 = vpop.eup %2682  ;;  %2502 = vmatpush1.bf16.msra.mxu0 %v2501_v55 }
 0x2f8   : > { %v2685_v43 = vpop.eup %2684 }
 0x2f9   : > { %2382 = vmatprep.mubr.msk.f32.mxu1 %vm1043_vm0, %v2685_v43 }
 0x2fa   : > { %2383 = vmatmul.mubr.msk.f32.gmra.mrb[42].mxu1 %vm1043_vm0, %v2683_v61 }
 0x2fb   : > { %v2687_v31 = vpop.eup %2686 }
 0x2fc   : > { %v2689_v3 = vpop.eup %2688 }
 0x2fd   : > { %2385 = vmatprep.mubr.msk.f32.mxu1 %vm1043_vm0, %v2689_v3 }
 0x2fe   : > { %2386 = vmatmul.mubr.msk.f32.gmra.mrb[44].mxu1 %vm1043_vm0, %v2687_v31 }
 0x2ff   : > { %v2691_v44 = vpop.eup %2690 }
 0x300   : > { %v2693_v30 = vpop.eup %2692 }
 0x301   : > { %2388 = vmatprep.mubr.msk.f32.mxu1 %vm1043_vm0, %v2693_v30 }
 0x302   : > { %2389 = vmatmul.mubr.msk.f32.gmra.mrb[46].mxu1 %vm1043_vm0, %v2691_v44 }
 0x3ad   : > { %v2369_v56 = vpop.f32.mrb[32].mxu1 }
 0x3ae   : > { %v1158_v57 = vpop.f32.mrb[33].mxu1  ;;  %v1164_v59 = vadd.f32 %v2369_v56, %v3635_v8 }
 0x3af   : > { %v1159_v58 = vadd.f32 %v3635_v8, %v1158_v57 }
 0x3b1   : > { %2694 = vtanh.f32 %v1159_v58 }
 0x3b2   : > { %2696 = vtanh.f32 %v1164_v59 }
 0x3b5   : > { %v2372_v60 = vpop.f32.mrb[34].mxu1 }
 0x3b6   : > { %v1168_v4 = vpop.f32.mrb[35].mxu1  ;;  %v1174_v6 = vadd.f32 %v2372_v60, %v3635_v8 }
 0x3b7   : > { %v1169_v13 = vadd.f32 %v3635_v8, %v1168_v4 }
 0x3b9   : > { %2698 = vtanh.f32 %v1169_v13 }
 0x3ba   : > { %2700 = vtanh.f32 %v1174_v6 }
 0x3bb   : > { %v2695_v12 = vpop.eup %2694 }
 0x3bc   : > { %1362 = vmatmul.mubr.f32.vlgmr.msra.gmra.mrb[16].mxu0 %v2695_v12  ;;  %v2697_v10 = vpop.eup %2696 }
 0x3bd   : > { %v2375_v9 = vpop.f32.mrb[36].mxu1  ;;  %1367 = vmatprep.mubr.f32.mxu0 %v3051_v2 }
 0x3be   : > { %v1178_v18 = vpop.f32.mrb[37].mxu1  ;;  %v1184_v15 = vadd.f32 %v2375_v9, %v3635_v8 }
 0x3bf   : > { %v1179_v11 = vadd.f32 %v3635_v8, %v1178_v18 }
 0x3c0   : > { %1368 = vmatmul.mubr.f32.gmra.mrb[18].mxu0 %v2697_v10 }
 0x3c1   : > { %2702 = vtanh.f32 %v1179_v11  ;;  %1373 = vmatprep.mubr.f32.mxu0 %v3051_v2 }
 0x3c2   : > { %2704 = vtanh.f32 %v1184_v15 }
 0x3c3   : > { %v2699_v14 = vpop.eup %2698 }
 0x3c4   : > { %1374 = vmatmul.mubr.f32.gmra.mrb[20].mxu0 %v2699_v14  ;;  %v2701_v21 = vpop.eup %2700 }
 0x3c5   : > { %v2378_v16 = vpop.f32.mrb[38].mxu1  ;;  %1379 = vmatprep.mubr.f32.mxu0 %v3051_v2 }
 0x3c6   : > { %v1188_v17 = vpop.f32.mrb[39].mxu1  ;;  %v1194_v23 = vadd.f32 %v2378_v16, %v3635_v8 }
 0x3c7   : > { %v1189_v22 = vadd.f32 %v3635_v8, %v1188_v17 }
 0x3c8   : > { %1380 = vmatmul.mubr.f32.gmra.mrb[22].mxu0 %v2701_v21 }
 0x3c9   : > { %2706 = vtanh.f32 %v1189_v22  ;;  %v2381_v24 = vpop.f32.mrb[40].mxu1  ;;  %1385 = vmatprep.mubr.f32.mxu0 %v3051_v2 }
 0x3ca   : > { %v1198_v20 = vpop.f32.mrb[41].mxu1  ;;  %2708 = vtanh.f32 %v1194_v23  ;;  %v1204_v7 = vadd.f32 %v2381_v24, %v3635_v8 }
 0x3cb   : > { %v2703_v35 = vpop.eup %2702  ;;  %v1199_v36 = vadd.f32 %v3635_v8, %v1198_v20 }
 0x3cc   : > { %1386 = vmatmul.mubr.f32.gmra.mrb[24].mxu0 %v2703_v35  ;;  %v2705_v33 = vpop.eup %2704 }
 0x3cd   : > { %1391 = vmatprep.mubr.f32.mxu0 %v3051_v2  ;;  %v2384_v41 = vpop.f32.mrb[42].mxu1  ;;  %2710 = vtanh.f32 %v1199_v36 }
 0x3ce   : > { %v1208_v19 = vpop.f32.mrb[43].mxu1  ;;  %2712 = vtanh.f32 %v1204_v7  ;;  %v1214_v42 = vadd.f32 %v2384_v41, %v3635_v8 }
 0x3cf   : > { %v1209_v38 = vadd.f32 %v3635_v8, %v1208_v19 }
 0x3d0   : > { %1392 = vmatmul.mubr.f32.gmra.mrb[26].mxu0 %v2705_v33 }
 0x3d1   : > { %1397 = vmatprep.mubr.f32.mxu0 %v3051_v2  ;;  %v2387_v34 = vpop.f32.mrb[44].mxu1  ;;  %2714 = vtanh.f32 %v1209_v38 }
 0x3d2   : > { %v1218_v40 = vpop.f32.mrb[45].mxu1  ;;  %2716 = vtanh.f32 %v1214_v42  ;;  %v1224_v43 = vadd.f32 %v2387_v34, %v3635_v8 }
 0x3d3   : > { %v2707_v37 = vpop.eup %2706  ;;  %v1219_v28 = vadd.f32 %v3635_v8, %v1218_v40 }
 0x3d4   : > { %1398 = vmatmul.mubr.f32.gmra.mrb[28].mxu0 %v2707_v37  ;;  %v2709_v62 = vpop.eup %2708 }
 0x3d5   : > { %1403 = vmatprep.mubr.f32.mxu0 %v3051_v2  ;;  %v2390_v39 = vpop.f32.mrb[46].mxu1  ;;  %2718 = vtanh.f32 %v1219_v28 }
 0x3d6   : > { %v1228_v29 = vpop.f32.mrb[47].mxu1  ;;  %2720 = vtanh.f32 %v1224_v43  ;;  %v1234_v30 = vadd.f32 %v2390_v39, %v3635_v8 }
 0x3d7   : > { %v2711_v54 = vpop.eup %2710  ;;  %v1229_v3 = vadd.f32 %v3635_v8, %v1228_v29 }
 0x3d8   : > { %1404 = vmatmul.mubr.f32.gmra.mrb[30].mxu0 %v2709_v62  ;;  %v2713_v61 = vpop.eup %2712 }
 0x3d9   : > { %1409 = vmatprep.mubr.f32.mxu0 %v3051_v2  ;;  %2722 = vtanh.f32 %v1229_v3 }
 0x3da   : > { %2724 = vtanh.f32 %v1234_v30 }
 0x3db   : > { %v2715_v31 = vpop.eup %2714 }
 0x3dc   : > { %1410 = vmatmul.mubr.f32.gmra.mrb[32].mxu0 %v2711_v54  ;;  %v2717_v44 = vpop.eup %2716 }
 0x3dd   : > { %1415 = vmatprep.mubr.f32.mxu0 %v3051_v2 }
 0x3df   : > { %v2719_v63 = vpop.eup %2718 }
 0x3e0   : > { %1416 = vmatmul.mubr.f32.gmra.mrb[34].mxu0 %v2713_v61  ;;  %v2721_v45 = vpop.eup %2720 }
 0x3e1   : > { %1421 = vmatprep.mubr.f32.mxu0 %v3051_v2 }
 0x3e3   : > { %v2723_v26 = vpop.eup %2722 }
 0x3e4   : > { %1422 = vmatmul.mubr.f32.gmra.mrb[36].mxu0 %v2715_v31  ;;  %v2725_v46 = vpop.eup %2724 }
 0x3e5   : > { %1427 = vmatprep.mubr.f32.mxu0 %v3051_v2 }
 0x3e8   : > { %1428 = vmatmul.mubr.f32.gmra.mrb[38].mxu0 %v2717_v44 }
 0x3e9   : > { %1433 = vmatprep.mubr.f32.mxu0 %v3051_v2 }
 0x3ec   : > { %1434 = vmatmul.mubr.f32.gmra.mrb[40].mxu0 %v2719_v63 }
 0x3ed   : > { %1439 = vmatprep.mubr.f32.mxu0 %v3051_v2 }
 0x3f0   : > { %1440 = vmatmul.mubr.f32.gmra.mrb[42].mxu0 %v2721_v45 }
 0x3f1   : > { %1445 = vmatprep.mubr.f32.mxu0 %v3051_v2 }
 0x3f4   : > { %1446 = vmatmul.mubr.f32.gmra.mrb[44].mxu0 %v2723_v26 }
 0x3f5   : > { %1451 = vmatprep.mubr.f32.mxu0 %v3051_v2 }
 0x3f8   : > { %1452 = vmatmul.mubr.f32.gmra.mrb[46].mxu0 %v2725_v46 }
 0x48f   : > { %v1363_v0 = vpop.f32.mrb[16].mxu0 }
 0x490   : > { %v3681_v1 = vadd.f32 %v1363_v0, %v3676_v51  ;;  %v1365_v47 = vpop.f32.mrb[17].mxu0 }
 0x491   : > { %v3684_v48 = vadd.f32 %v1365_v47, %v3678_v52 }
 0x492   : > { %1458 = vst [vmem:[%s3688_s23] sm:$0xff] %v3681_v1 }
 0x493   : > { %1459 = vst [vmem:[%s3688_s23 + $0x8] sm:$0xff] %v3684_v48  ;;  %v1369_v53 = vpop.f32.mrb[18].mxu0  ;;  %v1490_v5 = vmax.f32 %v3681_v1, %v3684_v48 }
 0x494   : > { %v3697_v55 = vadd.f32 %v1369_v53, %v3676_v51  ;;  %v1371_v2 = vpop.f32.mrb[19].mxu0 }
 0x495   : > { %v3700_v8 = vadd.f32 %v1371_v2, %v3678_v52  ;;  %1491 = vmax.xlane.f32.xlu0 %v1490_v5 }
 0x496   : > { %1460 = vst [vmem:[%s3688_s23 + $0x10] sm:$0xff] %v3697_v55 }
 0x497   : > { %1461 = vst [vmem:[%s3688_s23 + $0x18] sm:$0xff] %v3700_v8  ;;  %v1375_v56 = vpop.f32.mrb[20].mxu0  ;;  %v1493_v57 = vmax.f32 %v3697_v55, %v3700_v8 }
 0x498   : > { %v3709_v58 = vadd.f32 %v1375_v56, %v3676_v51  ;;  %v1377_v59 = vpop.f32.mrb[21].mxu0 }
 0x499   : > { %v3712_v60 = vadd.f32 %v1377_v59, %v3678_v52  ;;  %1494 = vmax.xlane.f32.xlu1 %v1493_v57 }
 0x49a   : > { %1462 = vst [vmem:[%s3688_s23 + $0x20] sm:$0xff] %v3709_v58 }
 0x49b   : > { %1463 = vst [vmem:[%s3688_s23 + $0x28] sm:$0xff] %v3712_v60  ;;  %v1381_v4 = vpop.f32.mrb[22].mxu0  ;;  %v1496_v13 = vmax.f32 %v3709_v58, %v3712_v60 }
 0x49c   : > { %v3721_v6 = vadd.f32 %v1381_v4, %v3676_v51  ;;  %v1383_v12 = vpop.f32.mrb[23].mxu0 }
 0x49d   : > { %v3724_v9 = vadd.f32 %v1383_v12, %v3678_v52  ;;  %1497 = vmax.xlane.f32.xlu0 %v1496_v13 }
 0x49e   : > { %1464 = vst [vmem:[%s3688_s23 + $0x30] sm:$0xff] %v3721_v6 }
 0x49f   : > { %1465 = vst [vmem:[%s3688_s23 + $0x38] sm:$0xff] %v3724_v9  ;;  %v1387_v18 = vpop.f32.mrb[24].mxu0  ;;  %v1499_v10 = vmax.f32 %v3721_v6, %v3724_v9 }
 0x4a0   : > { %v3733_v11 = vadd.f32 %v1387_v18, %v3676_v51  ;;  %v1389_v15 = vpop.f32.mrb[25].mxu0 }
 0x4a1   : > { %v3736_v14 = vadd.f32 %v1389_v15, %v3678_v52  ;;  %1500 = vmax.xlane.f32.xlu1 %v1499_v10 }
 0x4a2   : > { %1466 = vst [vmem:[%s3688_s23 + $0x40] sm:$0xff] %v3733_v11 }
 0x4a3   : > { %1467 = vst [vmem:[%s3688_s23 + $0x48] sm:$0xff] %v3736_v14  ;;  %v1393_v16 = vpop.f32.mrb[26].mxu0  ;;  %v1502_v17 = vmax.f32 %v3733_v11, %v3736_v14 }
 0x4a4   : > { %v3745_v21 = vadd.f32 %v1393_v16, %v3676_v51  ;;  %v1395_v22 = vpop.f32.mrb[27].mxu0 }
 0x4a5   : > { %v3748_v23 = vadd.f32 %v1395_v22, %v3678_v52  ;;  %1503 = vmax.xlane.f32.xlu0 %v1502_v17 }
 0x4a6   : > { %1468 = vst [vmem:[%s3688_s23 + $0x50] sm:$0xff] %v3745_v21 }
 0x4a7   : > { %1469 = vst [vmem:[%s3688_s23 + $0x58] sm:$0xff] %v3748_v23  ;;  %v1399_v24 = vpop.f32.mrb[28].mxu0  ;;  %v1505_v20 = vmax.f32 %v3745_v21, %v3748_v23 }
 0x4a8   : > { %v3757_v35 = vadd.f32 %v1399_v24, %v3676_v51  ;;  %v1401_v36 = vpop.f32.mrb[29].mxu0 }
 0x4a9   : > { %v3760_v41 = vadd.f32 %v1401_v36, %v3678_v52  ;;  %1506 = vmax.xlane.f32.xlu1 %v1505_v20  ;;  %v2822_v36 = vld [vmem:[%s3295_s30 + $0x10] sm:$0xff] }
 0x4aa   : > { %1470 = vst [vmem:[%s3688_s23 + $0x60] sm:$0xff] %v3757_v35 }
 0x4ab   : > { %1471 = vst [vmem:[%s3688_s23 + $0x68] sm:$0xff] %v3760_v41  ;;  %v1405_v19 = vpop.f32.mrb[30].mxu0  ;;  %v1508_v33 = vmax.f32 %v3757_v35, %v3760_v41 }
 0x4ac   : > { %v3769_v7 = vadd.f32 %v1405_v19, %v3676_v51  ;;  %v1407_v34 = vpop.f32.mrb[31].mxu0  ;;  %v2823_v19 = vld [vmem:[%s3295_s30 + $0x18] sm:$0xff] }
 0x4ad   : > { %v3772_v40 = vadd.f32 %v1407_v34, %v3678_v52  ;;  %1509 = vmax.xlane.f32.xlu0 %v1508_v33  ;;  %v535_v33 = vadd.f32 %v2823_v19, %v2822_v36  ;;  %v1730_v34 = vld [vmem:[%s3295_s30] sm:$0xff] }
 0x4ae   : > { %1472 = vst [vmem:[%s3688_s23 + $0x70] sm:$0xff] %v3769_v7 }
 0x4af   : > { %1473 = vst [vmem:[%s3688_s23 + $0x78] sm:$0xff] %v3772_v40  ;;  %v1411_v37 = vpop.f32.mrb[32].mxu0  ;;  %v1511_v38 = vmax.f32 %v3769_v7, %v3772_v40 }
 0x4b0   : > { %v3781_v39 = vadd.f32 %v1411_v37, %v3676_v51  ;;  %v1413_v29 = vpop.f32.mrb[33].mxu0  ;;  %v1731_v37 = vld [vmem:[%s3295_s30 + $0x8] sm:$0xff] }
 0x4b1   : > { %v3784_v62 = vadd.f32 %v1413_v29, %v3678_v52  ;;  %1512 = vmax.xlane.f32.xlu1 %v1511_v38  ;;  %v1732_v38 = vld [vmem:[%s3295_s30 + $0x10] sm:$0xff]  ;;  %v2824_v29 = vld [vmem:[%s3295_s30] sm:$0xff] }
 0x4b2   : > { %1474 = vst [vmem:[%s3688_s23 + $0x80] sm:$0xff] %v3781_v39 }
 0x4b3   : > { %1475 = vst [vmem:[%s3688_s23 + $0x88] sm:$0xff] %v3784_v62  ;;  %v1417_v42 = vpop.f32.mrb[34].mxu0  ;;  %v1514_v54 = vmax.f32 %v3781_v39, %v3784_v62 }
 0x4b4   : > { %v3793_v28 = vadd.f32 %v1417_v42, %v3676_v51  ;;  %v1419_v61 = vpop.f32.mrb[35].mxu0  ;;  %v2825_v42 = vld [vmem:[%s3295_s30 + $0x8] sm:$0xff] }
 0x4b5   : > { %v3796_v43 = vadd.f32 %v1419_v61, %v3678_v52  ;;  %1515 = vmax.xlane.f32.xlu0 %v1514_v54  ;;  %v532_v54 = vadd.f32 %v2825_v42, %v2824_v29  ;;  %v2826_v61 = vld [vmem:[%s3295_s30 + $0x20] sm:$0xff] }
 0x4b6   : > { %1476 = vst [vmem:[%s3688_s23 + $0x90] sm:$0xff] %v3793_v28 }
 0x4b7   : > { %1477 = vst [vmem:[%s3688_s23 + $0x98] sm:$0xff] %v3796_v43  ;;  %v1423_v31 = vpop.f32.mrb[36].mxu0  ;;  %v1517_v3 = vmax.f32 %v3793_v28, %v3796_v43 }
 0x4b8   : > { %v3805_v44 = vadd.f32 %v1423_v31, %v3676_v51  ;;  %v1425_v30 = vpop.f32.mrb[37].mxu0  ;;  %v2827_v31 = vld [vmem:[%s3295_s30 + $0x28] sm:$0xff] }
 0x4b9   : > { %v3808_v63 = vadd.f32 %v1425_v30, %v3678_v52  ;;  %1518 = vmax.xlane.f32.xlu1 %v1517_v3  ;;  %v538_v3 = vadd.f32 %v2827_v31, %v2826_v61  ;;  %v1762_v30 = vmul.f32 %v1730_v34, %v3681_v1  ;;  %v2830_v34 = vld [vmem:[%s3295_s30 + $0x40] sm:$0xff]  ;;  %v1741_v61 = vld [vmem:[%s3295_s30 + $0x58] sm:$0xff]  ;;  %v2832_v31 = vld [vmem:[%s3295_s30 + $0x50] sm:$0xff] }
 0x4ba   : > { %1478 = vst [vmem:[%s3688_s23 + $0xa0] sm:$0xff] %v3805_v44 }
 0x4bb   : > { %1479 = vst [vmem:[%s3688_s23 + $0xa8] sm:$0xff] %v3808_v63  ;;  %v1429_v45 = vpop.f32.mrb[38].mxu0  ;;  %v1520_v26 = vmax.f32 %v3805_v44, %v3808_v63 }
 0x4bc   : > { %v3817_v46 = vadd.f32 %v1429_v45, %v3676_v51  ;;  %v1431_v27 = vpop.f32.mrb[39].mxu0  ;;  %v1763_v45 = vmul.f32 %v1731_v37, %v3684_v48  ;;  %v2831_v37 = vld [vmem:[%s3295_s30 + $0x48] sm:$0xff] }
 0x4bd   : > { %v3820_v50 = vadd.f32 %v1431_v27, %v3678_v52  ;;  %1521 = vmax.xlane.f32.xlu0 %v1520_v26  ;;  %v1764_v26 = vmul.f32 %v1732_v38, %v3697_v55  ;;  %v544_v38 = vadd.f32 %v2831_v37, %v2830_v34  ;;  %v1746_v34 = vld [vmem:[%s3295_s30 + $0x80] sm:$0xff]  ;;  %v1747_v37 = vld [vmem:[%s3295_s30 + $0x88] sm:$0xff] }
 0x4be   : > { %1480 = vst [vmem:[%s3688_s23 + $0xb0] sm:$0xff] %v3817_v46 }
 0x4bf   : > { %1481 = vst [vmem:[%s3688_s23 + $0xb8] sm:$0xff] %v3820_v50  ;;  %v1435_v49 = vpop.f32.mrb[40].mxu0  ;;  %v1523_v0 = vmax.f32 %v3817_v46, %v3820_v50 }
 0x4c0   : > { %v3829_v47 = vadd.f32 %v1435_v49, %v3676_v51  ;;  %v1437_v53 = vpop.f32.mrb[41].mxu0  ;;  %v1734_v49 = vld [vmem:[%s3295_s30 + $0x20] sm:$0xff] }
 0x4c1   : > { %v3832_v5 = vadd.f32 %v1437_v53, %v3678_v52  ;;  %1524 = vmax.xlane.f32.xlu1 %v1523_v0  ;;  %v1735_v0 = vld [vmem:[%s3295_s30 + $0x28] sm:$0xff]  ;;  %v1794_v53 = vadd.f32 %v1763_v45, %v1762_v30 }
 0x4c2   : > { %1482 = vst [vmem:[%s3688_s23 + $0xc0] sm:$0xff] %v3829_v47 }
 0x4c3   : > { %1483 = vst [vmem:[%s3688_s23 + $0xc8] sm:$0xff] %v3832_v5  ;;  %v1441_v2 = vpop.f32.mrb[42].mxu0  ;;  %v1526_v56 = vmax.f32 %v3829_v47, %v3832_v5 }
 0x4c4   : > { %v3841_v57 = vadd.f32 %v1441_v2, %v3676_v51  ;;  %v1443_v59 = vpop.f32.mrb[43].mxu0 }
 0x4c5   : > { %v3844_v4 = vadd.f32 %v1443_v59, %v3678_v52  ;;  %1527 = vmax.xlane.f32.xlu0 %v1526_v56  ;;  %v1766_v56 = vmul.f32 %v1734_v49, %v3709_v58  ;;  %v1767_v59 = vmul.f32 %v1735_v0, %v3712_v60  ;;  %v1742_v49 = vld [vmem:[%s3295_s30 + $0x60] sm:$0xff]  ;;  %v1743_v0 = vld [vmem:[%s3295_s30 + $0x68] sm:$0xff] }
 0x4c6   : > { %1484 = vst [vmem:[%s3688_s23 + $0xd0] sm:$0xff] %v3841_v57 }
 0x4c7   : > { %1485 = vst [vmem:[%s3688_s23 + $0xd8] sm:$0xff] %v3844_v4  ;;  %v1447_v13 = vpop.f32.mrb[44].mxu0  ;;  %v1529_v12 = vmax.f32 %v3841_v57, %v3844_v4 }
 0x4c8   : > { %v3853_v18 = vadd.f32 %v1447_v13, %v3676_v51  ;;  %v1449_v10 = vpop.f32.mrb[45].mxu0  ;;  %v1736_v13 = vld [vmem:[%s3295_s30 + $0x30] sm:$0xff] }
 0x4c9   : > { %v3856_v15 = vadd.f32 %v1449_v10, %v3678_v52  ;;  %1530 = vmax.xlane.f32.xlu1 %v1529_v12  ;;  %v1737_v12 = vld [vmem:[%s3295_s30 + $0x38] sm:$0xff]  ;;  %v2828_v10 = vld [vmem:[%s3295_s30 + $0x30] sm:$0xff]  ;;  %v1768_v36 = vmul.f32 %v1736_v13, %v3721_v6  ;;  %v1774_v13 = vmul.f32 %v1742_v49, %v3757_v35 }
 0x4ca   : > { %1486 = vst [vmem:[%s3688_s23 + $0xe0] sm:$0xff] %v3853_v18  ;;  %v1769_v19 = vmul.f32 %v1737_v12, %v3724_v9  ;;  %v1775_v12 = vmul.f32 %v1743_v0, %v3760_v41 }
 0x4cb   : > { %1487 = vst [vmem:[%s3688_s23 + $0xe8] sm:$0xff] %v3856_v15  ;;  %v1453_v16 = vpop.f32.mrb[46].mxu0  ;;  %v1532_v17 = vmax.f32 %v3853_v18, %v3856_v15 }
 0x4cc   : > { %v3865_v22 = vadd.f32 %v1453_v16, %v3676_v51  ;;  %v1455_v24 = vpop.f32.mrb[47].mxu0  ;;  %v2829_v16 = vld [vmem:[%s3295_s30 + $0x38] sm:$0xff] }
 0x4cd   : > { %v3868_v20 = vadd.f32 %v1455_v24, %v3678_v52  ;;  %1533 = vmax.xlane.f32.xlu0 %v1532_v17  ;;  %v1733_v52 = vld [vmem:[%s3295_s30 + $0x18] sm:$0xff]  ;;  %v541_v17 = vadd.f32 %v2829_v16, %v2828_v10  ;;  %v1800_v24 = vadd.f32 %v1767_v59, %v1766_v56  ;;  %v1744_v10 = vld [vmem:[%s3295_s30 + $0x70] sm:$0xff] }
 0x4ce   : > { %1488 = vst [vmem:[%s3688_s23 + $0xf0] sm:$0xff] %v3865_v22  ;;  %v1765_v27 = vmul.f32 %v1733_v52, %v3700_v8  ;;  %v1803_v52 = vadd.f32 %v1769_v19, %v1768_v36  ;;  %v1745_v16 = vld [vmem:[%s3295_s30 + $0x78] sm:$0xff]  ;;  %v1812_v19 = vadd.f32 %v1775_v12, %v1774_v13  ;;  %v2844_v13 = vld [vmem:[%s3295_s30 + $0xb0] sm:$0xff] }
 0x4cf   : > { %1489 = vst [vmem:[%s3688_s23 + $0xf8] sm:$0xff] %v3868_v20  ;;  %v1535_v51 = vmax.f32 %v3865_v22, %v3868_v20  ;;  %v2845_v12 = vld [vmem:[%s3295_s30 + $0xb8] sm:$0xff] }
 0x4d0   : > { %v1797_v2 = vadd.f32 %v1765_v27, %v1764_v26  ;;  %v1773_v27 = vmul.f32 %v1741_v61, %v3748_v23  ;;  %v1779_v61 = vmul.f32 %v1747_v37, %v3784_v62 }
 0x4d1   : > { %1536 = vmax.xlane.f32.xlu1 %v1535_v51  ;;  %536 = vadd.xlane.f32.xlu0 %v535_v33  ;;  %v1738_v33 = vld [vmem:[%s3295_s30 + $0x40] sm:$0xff]  ;;  %v1739_v51 = vld [vmem:[%s3295_s30 + $0x48] sm:$0xff] }
 0x4d2   : > { %v1770_v29 = vmul.f32 %v1738_v33, %v3733_v11  ;;  %v1771_v42 = vmul.f32 %v1739_v51, %v3736_v14  ;;  %v1776_v33 = vmul.f32 %v1744_v10, %v3769_v7  ;;  %v1777_v51 = vmul.f32 %v1745_v16, %v3772_v40 }
 0x4d3   : > { %v565_v10 = vadd.f32 %v2845_v12, %v2844_v13 }
 0x4d4   : > { %v1806_v45 = vadd.f32 %v1771_v42, %v1770_v29  ;;  %v1815_v42 = vadd.f32 %v1777_v51, %v1776_v33 }
 0x4d5   : > { %533 = vadd.xlane.f32.xlu1 %v532_v54  ;;  %539 = vadd.xlane.f32.xlu0 %v538_v3  ;;  %v1740_v54 = vld [vmem:[%s3295_s30 + $0x50] sm:$0xff]  ;;  %v2833_v3 = vld [vmem:[%s3295_s30 + $0x58] sm:$0xff] }
 0x4d6   : > { %v547_v30 = vadd.f32 %v2833_v3, %v2832_v31  ;;  %v1772_v26 = vmul.f32 %v1740_v54, %v3745_v21  ;;  %v1778_v54 = vmul.f32 %v1746_v34, %v3781_v39  ;;  %v1748_v31 = vld [vmem:[%s3295_s30 + $0x90] sm:$0xff]  ;;  %v1749_v3 = vld [vmem:[%s3295_s30 + $0x98] sm:$0xff] }
 0x4d7   : > { %v1780_v49 = vmul.f32 %v1748_v31, %v3793_v28  ;;  %v1781_v0 = vmul.f32 %v1749_v3, %v3796_v43 }
 0x4d8   : > { %v1809_v59 = vadd.f32 %v1773_v27, %v1772_v26  ;;  %v1818_v27 = vadd.f32 %v1779_v61, %v1778_v54 }
 0x4d9   : > { %1795 = vadd.xlane.f32.xlu1 %v1794_v53  ;;  %1798 = vadd.xlane.f32.xlu0 %v1797_v2  ;;  %v2834_v53 = vld [vmem:[%s3295_s30 + $0x60] sm:$0xff]  ;;  %v2835_v2 = vld [vmem:[%s3295_s30 + $0x68] sm:$0xff] }
 0x4da   : > { %v550_v56 = vadd.f32 %v2835_v2, %v2834_v53  ;;  %v2842_v53 = vld [vmem:[%s3295_s30 + $0xa0] sm:$0xff]  ;;  %v2843_v2 = vld [vmem:[%s3295_s30 + $0xa8] sm:$0xff] }
 0x4dd   : > { %1801 = vadd.xlane.f32.xlu1 %v1800_v24  ;;  %542 = vadd.xlane.f32.xlu0 %v541_v17  ;;  %v2836_v17 = vld [vmem:[%s3295_s30 + $0x70] sm:$0xff]  ;;  %v2837_v24 = vld [vmem:[%s3295_s30 + $0x78] sm:$0xff] }
 0x4de   : > { %v553_v36 = vadd.f32 %v2837_v24, %v2836_v17 }
 0x4e1   : > { %545 = vadd.xlane.f32.xlu1 %v544_v38  ;;  %1804 = vadd.xlane.f32.xlu0 %v1803_v52  ;;  %v2838_v38 = vld [vmem:[%s3295_s30 + $0x80] sm:$0xff]  ;;  %v2839_v52 = vld [vmem:[%s3295_s30 + $0x88] sm:$0xff] }
 0x4e2   : > { %v556_v29 = vadd.f32 %v2839_v52, %v2838_v38 }
 0x4e5   : > { %1807 = vadd.xlane.f32.xlu1 %v1806_v45  ;;  %548 = vadd.xlane.f32.xlu0 %v547_v30  ;;  %v2840_v30 = vld [vmem:[%s3295_s30 + $0x90] sm:$0xff]  ;;  %v2841_v45 = vld [vmem:[%s3295_s30 + $0x98] sm:$0xff] }
 0x4e6   : > { %v559_v26 = vadd.f32 %v2841_v45, %v2840_v30 }
 0x4e9   : > { %551 = vadd.xlane.f32.xlu1 %v550_v56  ;;  %1810 = vadd.xlane.f32.xlu0 %v1809_v59  ;;  %v562_v56 = vadd.f32 %v2843_v2, %v2842_v53  ;;  %v1821_v59 = vadd.f32 %v1781_v0, %v1780_v49 }
 0x4ed   : > { %1813 = vadd.xlane.f32.xlu1 %v1812_v19  ;;  %554 = vadd.xlane.f32.xlu0 %v553_v36 }
 0x4f1   : > { %1816 = vadd.xlane.f32.xlu0 %v1815_v42  ;;  %557 = vadd.xlane.f32.xlu1 %v556_v29 }
 0x4f5   : > { %1819 = vadd.xlane.f32.xlu0 %v1818_v27  ;;  %560 = vadd.xlane.f32.xlu1 %v559_v26 }
 0x4f9   : > { %1822 = vadd.xlane.f32.xlu0 %v1821_v59  ;;  %563 = vadd.xlane.f32.xlu1 %v562_v56 }
 0x4fd   : > { %566 = vadd.xlane.f32.xlu1 %v565_v10 }
 0x522   : > { %v3940_v16 = vpop.xlane.xlu0 %1491 }
 0x523   : > { %v1538_v17 = vsub.f32 %v3681_v1, %v3940_v16  ;;  %v1539_v24 = vsub.f32 %v3684_v48, %v3940_v16 }
 0x525   : > { %v1570_v36 = vmul.f32 1.442695, %v1538_v17  ;;  %v1572_v19 = vmul.f32 1.442695, %v1539_v24 }
 0x526   : > { %v3946_v33 = vpop.xlane.xlu1 %1494 }
 0x527   : > { %2726 = vpow2.f32 %v1570_v36  ;;  %v1540_v51 = vsub.f32 %v3697_v55, %v3946_v33  ;;  %v1541_v34 = vsub.f32 %v3700_v8, %v3946_v33 }
 0x528   : > { %2728 = vpow2.f32 %v1572_v19 }
 0x529   : > { %v1574_v37 = vmul.f32 1.442695, %v1540_v51  ;;  %v1576_v38 = vmul.f32 1.442695, %v1541_v34 }
 0x52a   : > { %v3952_v52 = vpop.xlane.xlu0 %1497 }
 0x52b   : > { %2730 = vpow2.f32 %v1574_v37  ;;  %v1542_v1 = vsub.f32 %v3709_v58, %v3952_v52  ;;  %v1543_v48 = vsub.f32 %v3712_v60, %v3952_v52 }
 0x52c   : > { %2732 = vpow2.f32 %v1576_v38 }
 0x52d   : > { %v1578_v29 = vmul.f32 1.442695, %v1542_v1  ;;  %v1580_v42 = vmul.f32 1.442695, %v1543_v48 }
 0x52e   : > { %v3958_v54 = vpop.xlane.xlu1 %1500 }
 0x52f   : > { %2734 = vpow2.f32 %v1578_v29  ;;  %v1544_v55 = vsub.f32 %v3721_v6, %v3958_v54  ;;  %v1545_v8 = vsub.f32 %v3724_v9, %v3958_v54 }
 0x530   : > { %2736 = vpow2.f32 %v1580_v42 }
 0x531   : > { %v2727_v61 = vpop.eup %2726  ;;  %v1582_v31 = vmul.f32 1.442695, %v1544_v55  ;;  %v1584_v3 = vmul.f32 1.442695, %v1545_v8 }
 0x532   : > { %v2729_v58 = vpop.eup %2728  ;;  %v3964_v30 = vpop.xlane.xlu0 %1503 }
 0x533   : > { %2738 = vpow2.f32 %v1582_v31  ;;  %v1546_v60 = vsub.f32 %v3733_v11, %v3964_v30  ;;  %v1547_v45 = vsub.f32 %v3736_v14, %v3964_v30  ;;  %v1634_v26 = vadd.f32 %v2729_v58, %v2727_v61 }
 0x534   : > { %2740 = vpow2.f32 %v1584_v3 }
 0x535   : > { %v2731_v6 = vpop.eup %2730  ;;  %v1586_v27 = vmul.f32 1.442695, %v1546_v60  ;;  %v1588_v49 = vmul.f32 1.442695, %v1547_v45  ;;  %1635 = vadd.xlane.f32.xlu0 %v1634_v26 }
 0x536   : > { %v2733_v9 = vpop.eup %2732  ;;  %v3970_v0 = vpop.xlane.xlu1 %1506 }
 0x537   : > { %2742 = vpow2.f32 %v1586_v27  ;;  %v1548_v53 = vsub.f32 %v3745_v21, %v3970_v0  ;;  %v1549_v2 = vsub.f32 %v3748_v23, %v3970_v0  ;;  %v1637_v11 = vadd.f32 %v2733_v9, %v2731_v6 }
 0x538   : > { %2744 = vpow2.f32 %v1588_v49 }
 0x539   : > { %v2735_v56 = vpop.eup %2734  ;;  %v1590_v14 = vmul.f32 1.442695, %v1548_v53  ;;  %v1592_v59 = vmul.f32 1.442695, %v1549_v2  ;;  %1638 = vadd.xlane.f32.xlu1 %v1637_v11 }
 0x53a   : > { %v2737_v13 = vpop.eup %2736  ;;  %v3976_v12 = vpop.xlane.xlu0 %1509 }
 0x53b   : > { %2746 = vpow2.f32 %v1590_v14  ;;  %v1550_v10 = vsub.f32 %v3757_v35, %v3976_v12  ;;  %v1551_v17 = vsub.f32 %v3760_v41, %v3976_v12  ;;  %v1640_v21 = vadd.f32 %v2737_v13, %v2735_v56 }
 0x53c   : > { %2748 = vpow2.f32 %v1592_v59 }
 0x53d   : > { %v2739_v24 = vpop.eup %2738  ;;  %v1594_v23 = vmul.f32 1.442695, %v1550_v10  ;;  %v1596_v36 = vmul.f32 1.442695, %v1551_v17  ;;  %1641 = vadd.xlane.f32.xlu0 %v1640_v21  ;;  %v1750_v10 = vld [vmem:[%s3295_s30 + $0xa0] sm:$0xff]  ;;  %v1751_v17 = vld [vmem:[%s3295_s30 + $0xa8] sm:$0xff] }
 0x53e   : > { %v2741_v19 = vpop.eup %2740  ;;  %v3982_v51 = vpop.xlane.xlu1 %1512 }
 0x53f   : > { %2750 = vpow2.f32 %v1594_v23  ;;  %v1552_v34 = vsub.f32 %v3769_v7, %v3982_v51  ;;  %v1553_v37 = vsub.f32 %v3772_v40, %v3982_v51  ;;  %v1643_v35 = vadd.f32 %v2741_v19, %v2739_v24 }
 0x540   : > { %2752 = vpow2.f32 %v1596_v36 }
 0x541   : > { %v2743_v38 = vpop.eup %2742  ;;  %v1598_v41 = vmul.f32 1.442695, %v1552_v34  ;;  %v1600_v1 = vmul.f32 1.442695, %v1553_v37  ;;  %1644 = vadd.xlane.f32.xlu1 %v1643_v35  ;;  %v1782_v34 = vmul.f32 %v1750_v10, %v3805_v44  ;;  %v1783_v37 = vmul.f32 %v1751_v17, %v3808_v63 }
 0x542   : > { %v2745_v48 = vpop.eup %2744  ;;  %v3988_v29 = vpop.xlane.xlu0 %1515 }
 0x543   : > { %2754 = vpow2.f32 %v1598_v41  ;;  %v1554_v42 = vsub.f32 %v3781_v39, %v3988_v29  ;;  %v1555_v55 = vsub.f32 %v3784_v62, %v3988_v29  ;;  %v1646_v7 = vadd.f32 %v2745_v48, %v2743_v38 }
 0x544   : > { %2756 = vpow2.f32 %v1600_v1 }
 0x545   : > { %v2747_v8 = vpop.eup %2746  ;;  %v1602_v40 = vmul.f32 1.442695, %v1554_v42  ;;  %v1604_v61 = vmul.f32 1.442695, %v1555_v55  ;;  %1647 = vadd.xlane.f32.xlu0 %v1646_v7 }
 0x546   : > { %v2749_v31 = vpop.eup %2748  ;;  %v3994_v3 = vpop.xlane.xlu1 %1518 }
 0x547   : > { %2758 = vpow2.f32 %v1602_v40  ;;  %v1556_v58 = vsub.f32 %v3793_v28, %v3994_v3  ;;  %v1557_v60 = vsub.f32 %v3796_v43, %v3994_v3  ;;  %v1649_v39 = vadd.f32 %v2749_v31, %v2747_v8 }
 0x548   : > { %2760 = vpow2.f32 %v1604_v61  ;;  %v1824_v8 = vadd.f32 %v1783_v37, %v1782_v34 }
 0x549   : > { %v2751_v45 = vpop.eup %2750  ;;  %v1606_v62 = vmul.f32 1.442695, %v1556_v58  ;;  %v1608_v26 = vmul.f32 1.442695, %v1557_v60  ;;  %1650 = vadd.xlane.f32.xlu1 %v1649_v39 }
 0x54a   : > { %v2753_v6 = vpop.eup %2752  ;;  %v4000_v27 = vpop.xlane.xlu0 %1521 }
 0x54b   : > { %2762 = vpow2.f32 %v1606_v62  ;;  %v1558_v49 = vsub.f32 %v3805_v44, %v4000_v27  ;;  %v1559_v28 = vsub.f32 %v3808_v63, %v4000_v27  ;;  %v1652_v9 = vadd.f32 %v2753_v6, %v2751_v45 }
 0x54c   : > { %2764 = vpow2.f32 %v1608_v26 }
 0x54d   : > { %v2755_v43 = vpop.eup %2754  ;;  %v1610_v53 = vmul.f32 1.442695, %v1558_v49  ;;  %v1612_v2 = vmul.f32 1.442695, %v1559_v28  ;;  %1653 = vadd.xlane.f32.xlu0 %v1652_v9 }
 0x54e   : > { %v2757_v11 = vpop.eup %2756  ;;  %v4006_v56 = vpop.xlane.xlu1 %1524 }
 0x54f   : > { %2766 = vpow2.f32 %v1610_v53  ;;  %v1560_v14 = vsub.f32 %v3817_v46, %v4006_v56  ;;  %v1561_v59 = vsub.f32 %v3820_v50, %v4006_v56  ;;  %v1655_v13 = vadd.f32 %v2757_v11, %v2755_v43 }
 0x550   : > { %2768 = vpow2.f32 %v1612_v2 }
 0x551   : > { %v2759_v21 = vpop.eup %2758  ;;  %v1614_v24 = vmul.f32 1.442695, %v1560_v14  ;;  %v1616_v23 = vmul.f32 1.442695, %v1561_v59  ;;  %1656 = vadd.xlane.f32.xlu1 %v1655_v13 }
 0x552   : > { %v2761_v36 = vpop.eup %2760  ;;  %v4014_v19 = vpop.xlane.xlu0 %1527 }
 0x553   : > { %2770 = vpow2.f32 %v1614_v24  ;;  %v1562_v35 = vsub.f32 %v3829_v47, %v4014_v19  ;;  %v1563_v38 = vsub.f32 %v3832_v5, %v4014_v19  ;;  %v1658_v41 = vadd.f32 %v2761_v36, %v2759_v21 }
 0x554   : > { %2772 = vpow2.f32 %v1616_v23 }
 0x555   : > { %v2763_v1 = vpop.eup %2762  ;;  %v1618_v48 = vmul.f32 1.442695, %v1562_v35  ;;  %v1620_v42 = vmul.f32 1.442695, %v1563_v38  ;;  %1659 = vadd.xlane.f32.xlu0 %v1658_v41  ;;  %v1752_v35 = vld [vmem:[%s3295_s30 + $0xb0] sm:$0xff]  ;;  %v1753_v38 = vld [vmem:[%s3295_s30 + $0xb8] sm:$0xff] }
 0x556   : > { %v2765_v55 = vpop.eup %2764  ;;  %v4022_v7 = vpop.xlane.xlu1 %1530 }
 0x557   : > { %2774 = vpow2.f32 %v1618_v48  ;;  %v1564_v44 = vsub.f32 %v3841_v57, %v4022_v7  ;;  %v1565_v63 = vsub.f32 %v3844_v4, %v4022_v7  ;;  %v1661_v40 = vadd.f32 %v2765_v55, %v2763_v1  ;;  %v2846_v1 = vld [vmem:[%s3295_s30 + $0xc0] sm:$0xff]  ;;  %v2847_v48 = vld [vmem:[%s3295_s30 + $0xc8] sm:$0xff] }
 0x558   : > { %2776 = vpow2.f32 %v1620_v42  ;;  %v568_v42 = vadd.f32 %v2847_v48, %v2846_v1 }
 0x559   : > { %v2767_v61 = vpop.eup %2766  ;;  %v1622_v31 = vmul.f32 1.442695, %v1564_v44  ;;  %v1624_v58 = vmul.f32 1.442695, %v1565_v63  ;;  %1662 = vadd.xlane.f32.xlu1 %v1661_v40  ;;  %1825 = vadd.xlane.f32.xlu0 %v1824_v8  ;;  %v1784_v44 = vmul.f32 %v1752_v35, %v3817_v46  ;;  %v1785_v63 = vmul.f32 %v1753_v38, %v3820_v50  ;;  %v1754_v40 = vld [vmem:[%s3295_s30 + $0xc0] sm:$0xff]  ;;  %v1757_v50 = vld [vmem:[%s3295_s30 + $0xd8] sm:$0xff] }
 0x55a   : > { %v2769_v60 = vpop.eup %2768  ;;  %v4028_v39 = vpop.xlane.xlu0 %1533 }
 0x55b   : > { %2778 = vpow2.f32 %v1622_v31  ;;  %v1566_v45 = vsub.f32 %v3853_v18, %v4028_v39  ;;  %v1567_v62 = vsub.f32 %v3856_v15, %v4028_v39  ;;  %v1664_v26 = vadd.f32 %v2769_v60, %v2767_v61  ;;  %v1755_v61 = vld [vmem:[%s3295_s30 + $0xc8] sm:$0xff]  ;;  %v2848_v31 = vld [vmem:[%s3295_s30 + $0xd0] sm:$0xff] }
 0x55c   : > { %2780 = vpow2.f32 %v1624_v58  ;;  %v2849_v58 = vld [vmem:[%s3295_s30 + $0xd8] sm:$0xff]  ;;  %v1787_v46 = vmul.f32 %v1755_v61, %v3832_v5  ;;  %v2852_v5 = vld [vmem:[%s3295_s30 + $0xf0] sm:$0xff] }
 0x55d   : > { %v2771_v6 = vpop.eup %2770  ;;  %v1626_v49 = vmul.f32 1.442695, %v1566_v45  ;;  %v1628_v28 = vmul.f32 1.442695, %v1567_v62  ;;  %1665 = vadd.xlane.f32.xlu1 %v1664_v26  ;;  %v571_v60 = vadd.f32 %v2849_v58, %v2848_v31  ;;  %v1827_v45 = vadd.f32 %v1785_v63, %v1784_v44  ;;  %v1756_v26 = vld [vmem:[%s3295_s30 + $0xd0] sm:$0xff] }
 0x55e   : > { %v2773_v9 = vpop.eup %2772  ;;  %v4034_v43 = vpop.xlane.xlu1 %1536  ;;  %v1786_v62 = vmul.f32 %v1754_v40, %v3829_v47  ;;  %v1761_v47 = vld [vmem:[%s3295_s30 + $0xf8] sm:$0xff] }
 0x55f   : > { %2782 = vpow2.f32 %v1626_v49  ;;  %v1568_v53 = vsub.f32 %v3865_v22, %v4034_v43  ;;  %v1569_v2 = vsub.f32 %v3868_v20, %v4034_v43  ;;  %v1667_v11 = vadd.f32 %v2773_v9, %v2771_v6  ;;  %v2850_v6 = vld [vmem:[%s3295_s30 + $0xe0] sm:$0xff]  ;;  %v2851_v49 = vld [vmem:[%s3295_s30 + $0xe8] sm:$0xff] }
 0x560   : > { %2784 = vpow2.f32 %v1628_v28  ;;  %v574_v28 = vadd.f32 %v2851_v49, %v2850_v6  ;;  %v1788_v9 = vmul.f32 %v1756_v26, %v3841_v57 }
 0x561   : > { %v2775_v14 = vpop.eup %2774  ;;  %v1630_v59 = vmul.f32 1.442695, %v1568_v53  ;;  %v1632_v13 = vmul.f32 1.442695, %v1569_v2  ;;  %1668 = vadd.xlane.f32.xlu0 %v1667_v11  ;;  %v1789_v53 = vmul.f32 %v1757_v50, %v3844_v4  ;;  %v1830_v2 = vadd.f32 %v1787_v46, %v1786_v62  ;;  %v1758_v11 = vld [vmem:[%s3295_s30 + $0xe0] sm:$0xff] }
 0x562   : > { %v2777_v10 = vpop.eup %2776  ;;  %v1793_v4 = vmul.f32 %v1761_v47, %v3868_v20 }
 0x563   : > { %2786 = vpow2.f32 %v1630_v59  ;;  %v1670_v17 = vadd.f32 %v2777_v10, %v2775_v14  ;;  %v1759_v14 = vld [vmem:[%s3295_s30 + $0xe8] sm:$0xff]  ;;  %v1760_v59 = vld [vmem:[%s3295_s30 + $0xf0] sm:$0xff] }
 0x564   : > { %2788 = vpow2.f32 %v1632_v13  ;;  %v2853_v13 = vld [vmem:[%s3295_s30 + $0xf8] sm:$0xff]  ;;  %v1792_v57 = vmul.f32 %v1760_v59, %v3865_v22 }
 0x565   : > { %v2779_v21 = vpop.eup %2778  ;;  %1671 = vadd.xlane.f32.xlu1 %v1670_v17  ;;  %v577_v10 = vadd.f32 %v2853_v13, %v2852_v5  ;;  %v1833_v17 = vadd.f32 %v1789_v53, %v1788_v9 }
 0x566   : > { %v2781_v24 = vpop.eup %2780 }
 0x567   : > { %v1673_v23 = vadd.f32 %v2781_v24, %v2779_v21  ;;  %v1790_v21 = vmul.f32 %v1758_v11, %v3853_v18  ;;  %v1791_v24 = vmul.f32 %v1759_v14, %v3856_v15 }
 0x569   : > { %v2783_v36 = vpop.eup %2782  ;;  %1674 = vadd.xlane.f32.xlu0 %v1673_v23  ;;  %v1836_v23 = vadd.f32 %v1791_v24, %v1790_v21 }
 0x56a   : > { %v2785_v34 = vpop.eup %2784 }
 0x56b   : > { %v1676_v37 = vadd.f32 %v2785_v34, %v2783_v36  ;;  %v1839_v36 = vadd.f32 %v1793_v4, %v1792_v57  ;;  %v4068_v34 = vpop.xlane.xlu0 %536 }
 0x56d   : > { %v2787_v41 = vpop.eup %2786  ;;  %1677 = vadd.xlane.f32.xlu1 %v1676_v37  ;;  %v4070_v37 = vpop.xlane.xlu1 %533 }
 0x56e   : > { %v2789_v55 = vpop.eup %2788 }
 0x56f   : > { %v1679_v8 = vadd.f32 %v2789_v55, %v2787_v41  ;;  %v4072_v18 = vpop.xlane.xlu0 %539 }
 0x571   : > { %1680 = vadd.xlane.f32.xlu0 %v1679_v8  ;;  %569 = vadd.xlane.f32.xlu1 %v568_v42  ;;  %v4074_v15 = vpop.xlane.xlu1 %1795 }
 0x573   : > { %v4076_v22 = vpop.xlane.xlu0 %1798 }
 0x575   : > { %1828 = vadd.xlane.f32.xlu0 %v1827_v45  ;;  %572 = vadd.xlane.f32.xlu1 %v571_v60  ;;  %v4078_v35 = vpop.xlane.xlu1 %1801 }
 0x577   : > { %v4087_v20 = vpop.xlane.xlu0 %542 }
 0x579   : > { %1831 = vadd.xlane.f32.xlu0 %v1830_v2  ;;  %575 = vadd.xlane.f32.xlu1 %v574_v28  ;;  %v4091_v38 = vpop.xlane.xlu1 %545 }
 0x57d   : > { %1834 = vadd.xlane.f32.xlu0 %v1833_v17  ;;  %578 = vadd.xlane.f32.xlu1 %v577_v10 }
 0x581   : > { %1837 = vadd.xlane.f32.xlu0 %v1836_v23  ;;  %1840 = vadd.xlane.f32.xlu1 %v1839_v36 }
 0x582   : > { %2953 = shalt.err (!%p2950_p2)
}
 0x583   : > { %s2954_s26 = scalar_lea.hbm %s4084_s22, 4096  ;;  %s2958_s30 = scalar_lea.hbm %s4294_s9, 8192 }
 0x584   : > { %p2955_p13 = scmp.ne.s32.totalorder %s4084_s22, %s2954_s26  ;;  %p2959_p4 = scmp.lt.u32.totalorder %s4084_s22, %s4294_s9 }
 0x585   : > { %p2960_p7 = scmp.lt.u32.totalorder %s2958_s30, %s2954_s26  ;;  %p2962_p11 = scmp.lt.u32.totalorder %s2954_s26, %s4084_s22 }
 0x586   : > { %p2956_p6 = pnand %p2955_p13, %p4317_p0 }
 0x587   : > { %p2961_p8 = por %p2960_p7, %p2959_p4 }
 0x588   : > { %p2957_p10 = pneg %p2956_p6 }
 0x589   : > { %p2963_p1 = por %p2962_p11, %p2961_p8 }
 0x58b   : > { %p2964_p3 = pnand %p2963_p1, %p2957_p10 }
 0x58d   : > { %2967 = shalt.err (!%p2964_p3)
}
 0x58e   : > { %s3053_s21 = smov 256   ;;  %s3054_s25 = smov 16   ;;  %v4117_v41 = vpop.xlane.xlu0 %1804  ;;  %v4119_v1 = vpop.xlane.xlu1 %1807 }
 0x58f   : > { %2529 = dma.vmem_to_hbm [thread:$0]  (%p4317_p0), %s4089_s18, 4096, %s4084_s22, %s1964_s19, %s3053_s21, %s3053_s21, %s3054_s25  }
 0x590   : > { %s2152_s22 = sshll.u32 %s3132_s17, 4  ;;  %s417_s18 = scalar_lea.vmem [#allocation9], %s3289_s27 }
 0x591   : > { %s1998_s19 = sshll.u32 %s417_s18, 4  ;;  %s4241_s23 = scalar_lea.hbm %s4295_s10, %s2152_s22  ;;  %s4243_s19 = int_to_ptr.vmem [resolvable:$true] %s1998_s19 }
 0x592   : > { %v4121_v48 = vpop.xlane.xlu0 %548  ;;  %v4123_v42 = vpop.xlane.xlu1 %551  ;;  %s1969_s12 = scalar_lea.sflag [#allocation10], %s3289_s27  ;;  %s2968_s30 = scalar_lea.vmem %s4243_s19, 16 }
 0x593   : > { %p2969_p5 = scmp.ne.s32.totalorder %s4243_s19, %s2968_s30  ;;  %s3055_s17 = smov [#allocation9]  }
 0x594   : > { %s2972_s20 = sshll.u32 %s3055_s17, 4  ;;  %s2973_s20 = int_to_ptr.vmem [resolvable:$false] %s2972_s20 }
 0x595   : > { %p2970_p9 = pnand %p2969_p5, %p4317_p0  ;;  %s2974_s13 = scalar_lea.vmem %s2973_s20, 32 }
 0x596   : > { %v4125_v55 = vpop.xlane.xlu0 %1810  ;;  %v4127_v8 = vpop.xlane.xlu1 %1813  ;;  %p2975_p2 = scmp.lt.s32.totalorder %s4243_s19, %s2973_s20  ;;  %p2976_p13 = scmp.lt.s32.totalorder %s2974_s13, %s2968_s30 }
 0x597   : > { %p2971_p12 = pneg %p2970_p9 }
 0x598   : > { %p2977_p6 = por %p2976_p13, %p2975_p2 }
 0x59a   : > { %v4129_v44 = vpop.xlane.xlu0 %554  ;;  %v4131_v63 = vpop.xlane.xlu1 %557  ;;  %p2978_p10 = pnand %p2977_p6, %p2971_p12 }
 0x59e   : > { %v4133_v40 = vpop.xlane.xlu0 %1816  ;;  %v4135_v61 = vpop.xlane.xlu1 %560 }
 0x5a2   : > { %v4137_v31 = vpop.xlane.xlu0 %1819  ;;  %v4139_v58 = vpop.xlane.xlu1 %563 }
 0x5a6   : > { %v4141_v60 = vpop.xlane.xlu0 %1822  ;;  %v4143_v45 = vpop.xlane.xlu1 %566 }
 0x5c2   : > { %v1636_v62 = vpop.xlane.xlu0 %1635 }
 0x5c6   : > { %v1639_v46 = vpop.xlane.xlu1 %1638 }
 0x5c7   : > { %2790 = vlog2.f32 %v1639_v46 }
 0x5c8   : > { %2792 = vlog2.f32 %v1636_v62 }
 0x5ca   : > { %v1642_v26 = vpop.xlane.xlu0 %1641 }
 0x5cb   : > { %2794 = vlog2.f32 %v1642_v26 }
 0x5ce   : > { %v1645_v50 = vpop.xlane.xlu1 %1644 }
 0x5cf   : > { %2796 = vlog2.f32 %v1645_v50 }
 0x5d1   : > { %v2791_v9 = vpop.eup %2790 }
 0x5d2   : > { %v1648_v6 = vpop.xlane.xlu0 %1647  ;;  %v2793_v2 = vpop.eup %2792  ;;  %v1685_v14 = vmul.f32 0.6931472, %v2791_v9 }
 0x5d3   : > { %2798 = vlog2.f32 %v1648_v6  ;;  %v1683_v5 = vmul.f32 0.6931472, %v2793_v2 }
 0x5d4   : > { %v1715_v17 = vadd.f32 %v1685_v14, %v3946_v33 }
 0x5d5   : > { %v2795_v11 = vpop.eup %2794  ;;  %v1714_v4 = vadd.f32 %v1683_v5, %v3940_v16 }
 0x5d6   : > { %v1651_v49 = vpop.xlane.xlu1 %1650  ;;  %v1687_v13 = vmul.f32 0.6931472, %v2795_v11  ;;  %v1843_v46 = vmul.f32 %v1715_v17, %v4068_v34  ;;  %v1892_v34 = vadd.s32 8, %v3669_v32 }
 0x5d7   : > { %2800 = vlog2.f32 %v1651_v49 }
 0x5d8   : > { %v1716_v36 = vadd.f32 %v1687_v13, %v3952_v52  ;;  %v4156_v52 = vand.u32 127, %v1287_v25  ;;  %v1894_v13 = vadd.s32 24, %v3669_v32 }
 0x5d9   : > { %v2797_v47 = vpop.eup %2796 }
 0x5da   : > { %v1654_v28 = vpop.xlane.xlu0 %1653  ;;  %v1689_v21 = vmul.f32 0.6931472, %v2797_v47  ;;  %vm1909_vm1 = vcmp.eq.s32.totalorder %v3669_v32, %v4156_v52  ;;  %vm1910_vm2 = vcmp.eq.s32.totalorder %v1892_v34, %v4156_v52  ;;  %vm1912_vm4 = vcmp.eq.s32.totalorder %v1894_v13, %v4156_v52 }
 0x5db   : > { %2802 = vlog2.f32 %v1654_v28  ;;  %v1842_v28 = vmul.f32 %v1714_v4, %v4070_v37 }
 0x5dc   : > { %v1717_v26 = vadd.f32 %v1689_v21, %v3958_v54  ;;  %v1859_v54 = vsub.f32 %v4076_v22, %v1843_v46 }
 0x5dd   : > { %v2799_v10 = vpop.eup %2798  ;;  %v1858_v37 = vsub.f32 %v4074_v15, %v1842_v28 }
 0x5de   : > { %v1657_v53 = vpop.xlane.xlu1 %1656  ;;  %v1691_v62 = vmul.f32 0.6931472, %v2799_v10  ;;  %v1845_v11 = vmul.f32 %v1717_v26, %v4087_v20 }
 0x5df   : > { %2804 = vlog2.f32 %v1657_v53  ;;  %v1844_v53 = vmul.f32 %v1716_v36, %v4072_v18  ;;  %v1893_v18 = vadd.s32 16, %v3669_v32  ;;  %v1896_v36 = vadd.s32 40, %v3669_v32 }
 0x5e0   : > { %v1718_v16 = vadd.f32 %v1691_v62, %v3964_v30  ;;  %v1861_v15 = vsub.f32 %v4117_v41, %v1845_v11 }
 0x5e1   : > { %v2801_v57 = vpop.eup %2800  ;;  %v1860_v25 = vsub.f32 %v4078_v35, %v1844_v53  ;;  %v1874_v35 = vsub.f32 0.0, %v1858_v37  ;;  %vm1911_vm3 = vcmp.eq.s32.totalorder %v1893_v18, %v4156_v52  ;;  %vm1914_vm6 = vcmp.eq.s32.totalorder %v1896_v36, %v4156_v52 }
 0x5e2   : > { %v1660_v59 = vpop.xlane.xlu0 %1659  ;;  %v1693_v49 = vmul.f32 0.6931472, %v2801_v57  ;;  %v1846_v22 = vmul.f32 %v1718_v16, %v4091_v38  ;;  %v1895_v38 = vadd.s32 32, %v3669_v32 }
 0x5e3   : > { %2806 = vlog2.f32 %v1660_v59  ;;  %v1876_v4 = vsub.f32 0.0, %v1860_v25  ;;  %v1899_v25 = vadd.s32 64, %v3669_v32 }
 0x5e4   : > { %v1719_v59 = vadd.f32 %v1693_v49, %v3970_v0  ;;  %v1875_v0 = vsub.f32 0.0, %v1859_v54  ;;  %v1862_v41 = vsub.f32 %v4119_v1, %v1846_v22  ;;  %v1925_v1 = vsel %vm1909_vm1, %v1874_v35, 0.0 }
 0x5e5   : > { %v2803_v23 = vpop.eup %2802  ;;  %vm1913_vm5 = vcmp.eq.s32.totalorder %v1895_v38, %v4156_v52  ;;  %v1927_v28 = vsel %vm1911_vm3, %v1876_v4, 0.0  ;;  %v1901_v38 = vadd.s32 80, %v3669_v32  ;;  %vm1917_vm9 = vcmp.eq.s32.totalorder %v1899_v25, %v4156_v52 }
 0x5e6   : > { %v1663_v24 = vpop.xlane.xlu1 %1662  ;;  %v4150_v50 = vpop.xlane.xlu0 %1825  ;;  %v1695_v9 = vmul.f32 0.6931472, %v2803_v23  ;;  %v1847_v17 = vmul.f32 %v1719_v59, %v4121_v48  ;;  %v1877_v48 = vsub.f32 0.0, %v1861_v15 }
 0x5e7   : > { %2808 = vlog2.f32 %v1663_v24  ;;  %vm1919_vm11 = vcmp.eq.s32.totalorder %v1901_v38, %v4156_v52 }
 0x5e8   : > { %v1720_v30 = vadd.f32 %v1695_v9, %v3976_v12  ;;  %v1863_v26 = vsub.f32 %v4125_v55, %v1847_v17  ;;  %v1878_v55 = vsub.f32 0.0, %v1862_v41  ;;  %v1928_v53 = vsel %vm1912_vm4, %v1877_v48, 0.0 }
 0x5e9   : > { %v2805_v33 = vpop.eup %2804 }
 0x5ea   : > { %v1666_v6 = vpop.xlane.xlu1 %1665  ;;  %v1697_v47 = vmul.f32 0.6931472, %v2805_v33  ;;  %v1848_v24 = vmul.f32 %v1720_v30, %v4123_v42  ;;  %v1879_v34 = vsub.f32 0.0, %v1863_v26  ;;  %v1929_v59 = vsel %vm1913_vm5, %v1878_v55, 0.0 }
 0x5eb   : > { %2810 = vlog2.f32 %v1666_v6 }
 0x5ec   : > { %v1721_v12 = vadd.f32 %v1697_v47, %v3982_v51  ;;  %v1926_v51 = vsel %vm1910_vm2, %v1875_v0, 0.0  ;;  %v1864_v49 = vsub.f32 %v4127_v8, %v1848_v24  ;;  %v1930_v13 = vsel %vm1914_vm6, %v1879_v34, 0.0 }
 0x5ed   : > { %v2807_v2 = vpop.eup %2806  ;;  %v1941_v9 = vadd.f32 %v1926_v51, %v1925_v1  ;;  %v1902_v51 = vadd.s32 88, %v3669_v32 }
 0x5ee   : > { %v1669_v14 = vpop.xlane.xlu0 %1668  ;;  %v1699_v10 = vmul.f32 0.6931472, %v2807_v2  ;;  %v1849_v42 = vmul.f32 %v1721_v12, %v4129_v44 }
 0x5ef   : > { %2812 = vlog2.f32 %v1669_v14  ;;  %v1942_v11 = vadd.f32 %v1941_v9, %v1927_v28  ;;  %vm1920_vm12 = vcmp.eq.s32.totalorder %v1902_v51, %v4156_v52  ;;  %v1904_v28 = vadd.s32 104, %v3669_v32 }
 0x5f0   : > { %v1722_v23 = vadd.f32 %v1699_v10, %v3988_v29  ;;  %v1897_v29 = vadd.s32 48, %v3669_v32  ;;  %v1865_v8 = vsub.f32 %v4133_v40, %v1849_v42  ;;  %v1903_v42 = vadd.s32 96, %v3669_v32 }
 0x5f1   : > { %v2809_v5 = vpop.eup %2808  ;;  %v1943_v40 = vadd.f32 %v1942_v11, %v1928_v53  ;;  %vm1922_vm14 = vcmp.eq.s32.totalorder %v1904_v28, %v4156_v52 }
 0x5f2   : > { %v1672_v20 = vpop.xlane.xlu1 %1671  ;;  %v1701_v21 = vmul.f32 0.6931472, %v2809_v5  ;;  %v1850_v44 = vmul.f32 %v1722_v23, %v4131_v63  ;;  %vm1915_vm7 = vcmp.eq.s32.totalorder %v1897_v29, %v4156_v52  ;;  %v1880_v63 = vsub.f32 0.0, %v1864_v49 }
 0x5f3   : > { %2814 = vlog2.f32 %v1672_v20  ;;  %v1881_v22 = vsub.f32 0.0, %v1865_v8  ;;  %v1944_v0 = vadd.f32 %v1943_v40, %v1929_v59  ;;  %vm1921_vm13 = vcmp.eq.s32.totalorder %v1903_v42, %v4156_v52 }
 0x5f4   : > { %v1723_v6 = vadd.f32 %v1701_v21, %v3994_v3  ;;  %v1866_v47 = vsub.f32 %v4137_v31, %v1850_v44  ;;  %v1931_v31 = vsel %vm1915_vm7, %v1880_v63, 0.0 }
 0x5f5   : > { %v2811_v57 = vpop.eup %2810  ;;  %v1945_v21 = vadd.f32 %v1944_v0, %v1930_v13 }
 0x5f6   : > { %v1703_v62 = vmul.f32 0.6931472, %v2811_v57  ;;  %v1675_v46 = vpop.xlane.xlu0 %1674  ;;  %v1851_v54 = vmul.f32 %v1723_v6, %v4135_v61  ;;  %v1882_v15 = vsub.f32 0.0, %v1866_v47 }
 0x5f7   : > { %2816 = vlog2.f32 %v1675_v46  ;;  %v1946_v23 = vadd.f32 %v1945_v21, %v1931_v31 }
 0x5f8   : > { %v1724_v3 = vadd.f32 %v1703_v62, %v4000_v27  ;;  %v1898_v27 = vadd.s32 56, %v3669_v32  ;;  %v1867_v10 = vsub.f32 %v4141_v60, %v1851_v54  ;;  %v1933_v36 = vsel %vm1917_vm9, %v1882_v15, 0.0 }
 0x5f9   : > { %v2813_v33 = vpop.eup %2812 }
 0x5fa   : > { %v1705_v16 = vmul.f32 0.6931472, %v2813_v33  ;;  %v1678_v2 = vpop.xlane.xlu1 %1677  ;;  %v1852_v37 = vmul.f32 %v1724_v3, %v4139_v58  ;;  %vm1916_vm8 = vcmp.eq.s32.totalorder %v1898_v27, %v4156_v52  ;;  %v1883_v4 = vsub.f32 0.0, %v1867_v10 }
 0x5fb   : > { %2818 = vlog2.f32 %v1678_v2  ;;  %v1932_v57 = vsel %vm1916_vm8, %v1881_v22, 0.0  ;;  %v1905_v27 = vadd.s32 112, %v3669_v32 }
 0x5fc   : > { %v1725_v18 = vadd.f32 %v1705_v16, %v4006_v56  ;;  %v1900_v56 = vadd.s32 72, %v3669_v32  ;;  %v1868_v20 = vsub.f32 %v4150_v50, %v1852_v37  ;;  %v1947_v46 = vadd.f32 %v1946_v23, %v1932_v57 }
 0x5fd   : > { %v2815_v14 = vpop.eup %2814  ;;  %vm1923_vm15 = vcmp.eq.s32.totalorder %v1905_v27, %v4156_v52 }
 0x5fe   : > { %v1707_v30 = vmul.f32 0.6931472, %v2815_v14  ;;  %v570_v61 = vpop.xlane.xlu1 %569  ;;  %v1681_v5 = vpop.xlane.xlu0 %1680  ;;  %v1853_v12 = vmul.f32 %v1725_v18, %v4143_v45  ;;  %vm1918_vm10 = vcmp.eq.s32.totalorder %v1900_v56, %v4156_v52  ;;  %v1884_v48 = vsub.f32 0.0, %v1868_v20 }
 0x5ff   : > { %2820 = vlog2.f32 %v1681_v5  ;;  %v1934_v1 = vsel %vm1918_vm10, %v1883_v4, 0.0  ;;  %v1948_v33 = vadd.f32 %v1947_v46, %v1933_v36 }
 0x600   : > { %v1726_v17 = vadd.f32 %v1707_v30, %v4014_v19  ;;  %v1935_v44 = vsel %vm1919_vm11, %v1884_v48, 0.0 }
 0x601   : > { %v2817_v58 = vpop.eup %2816  ;;  %v1949_v16 = vadd.f32 %v1948_v33, %v1934_v1 }
 0x602   : > { %v1709_v35 = vmul.f32 0.6931472, %v2817_v58  ;;  %v573_v60 = vpop.xlane.xlu1 %572  ;;  %v1829_v24 = vpop.xlane.xlu0 %1828  ;;  %v1854_v19 = vmul.f32 %v1726_v17, %v570_v61 }
 0x603   : > { %v1869_v41 = vsub.f32 %v1829_v24, %v1853_v12  ;;  %v1950_v11 = vadd.f32 %v1949_v16, %v1935_v44 }
 0x604   : > { %v1727_v45 = vadd.f32 %v1709_v35, %v4022_v7 }
 0x605   : > { %v2819_v50 = vpop.eup %2818  ;;  %v1885_v29 = vsub.f32 0.0, %v1869_v41 }
 0x606   : > { %v1711_v62 = vmul.f32 0.6931472, %v2819_v50  ;;  %v576_v26 = vpop.xlane.xlu1 %575  ;;  %v1832_v6 = vpop.xlane.xlu0 %1831  ;;  %v1855_v7 = vmul.f32 %v1727_v45, %v573_v60 }
 0x607   : > { %v1870_v49 = vsub.f32 %v1832_v6, %v1854_v19  ;;  %v1936_v8 = vsel %vm1920_vm12, %v1885_v29, 0.0 }
 0x608   : > { %v1728_v3 = vadd.f32 %v1711_v62, %v4028_v39  ;;  %v1906_v39 = vadd.s32 120, %v3669_v32  ;;  %v1951_v37 = vadd.f32 %v1950_v11, %v1936_v8 }
 0x609   : > { %v2821_v55 = vpop.eup %2820  ;;  %v1886_v9 = vsub.f32 0.0, %v1870_v49 }
 0x60a   : > { %v1713_v53 = vmul.f32 0.6931472, %v2821_v55  ;;  %v579_v2 = vpop.xlane.xlu1 %578  ;;  %v1835_v34 = vpop.xlane.xlu0 %1834  ;;  %v1856_v14 = vmul.f32 %v1728_v3, %v576_v26  ;;  %vm1924_vm0 = vcmp.eq.s32.totalorder %v1906_v39, %v4156_v52 }
 0x60b   : > { %v1871_v54 = vsub.f32 %v1835_v34, %v1855_v7  ;;  %v1937_v59 = vsel %vm1921_vm13, %v1886_v9, 0.0 }
 0x60c   : > { %v1729_v63 = vadd.f32 %v1713_v53, %v4034_v43  ;;  %v1952_v25 = vadd.f32 %v1951_v37, %v1937_v59 }
 0x60d   : > { %v1887_v47 = vsub.f32 0.0, %v1871_v54 }
 0x60e   : > { %v1857_v18 = vmul.f32 %v1729_v63, %v579_v2  ;;  %v1841_v40 = vpop.xlane.xlu1 %1840  ;;  %v1838_v30 = vpop.xlane.xlu0 %1837 }
 0x60f   : > { %v1938_v61 = vsel %vm1922_vm14, %v1887_v47, 0.0  ;;  %v1872_v5 = vsub.f32 %v1838_v30, %v1856_v14 }
 0x610   : > { %v1873_v13 = vsub.f32 %v1841_v40, %v1857_v18  ;;  %v1953_v22 = vadd.f32 %v1952_v25, %v1938_v61 }
 0x611   : > { %v1888_v43 = vsub.f32 0.0, %v1872_v5 }
 0x612   : > { %v1889_v10 = vsub.f32 0.0, %v1873_v13 }
 0x613   : > { %v1939_v0 = vsel %vm1923_vm15, %v1888_v43, 0.0 }
 0x614   : > { %v1940_v32 = vsel %vm1924_vm0, %v1889_v10, 0.0  ;;  %v1954_v31 = vadd.f32 %v1953_v22, %v1939_v0 }
 0x616   : > { %v1955_v56 = vadd.f32 %v1954_v31, %v1940_v32 }
 0x618   : > { %v1956_v58 = vrot.slane %v1955_v56, 4 }
 0x61a   : > { %v1957_v15 = vadd.f32 %v1956_v58, %v1955_v56 }
 0x61c   : > { %v1958_v20 = vrot.slane %v1957_v15, 2 }
 0x61e   : > { %v1959_v17 = vadd.f32 %v1958_v20, %v1957_v15 }
 0x620   : > { %v1960_v12 = vrot.slane %v1959_v17, 1 }
 0x622   : > { %v1961_v21 = vadd.f32 %v1960_v12, %v1959_v17 }
 0x624   : > { %1962 = vst [vmem:[%s417_s18] sm:$0x1] %v1961_v21 }
 0x625   : > { %2981 = shalt.err (!%p2978_p10)
}
 0x626   : > { %s2982_s27 = scalar_lea.hbm %s4241_s23, 16  ;;  %s2986_s22 = scalar_lea.hbm %s4295_s10, 32 }
 0x627   : > { %p2983_p4 = scmp.ne.s32.totalorder %s4241_s23, %s2982_s27  ;;  %p2987_p11 = scmp.lt.u32.totalorder %s4241_s23, %s4295_s10 }
 0x628   : > { %p2988_p1 = scmp.lt.u32.totalorder %s2986_s22, %s2982_s27  ;;  %p2990_p5 = scmp.lt.u32.totalorder %s2982_s27, %s4241_s23 }
 0x629   : > { %p2984_p7 = pnand %p2983_p4, %p4317_p0 }
 0x62a   : > { %p2989_p3 = por %p2988_p1, %p2987_p11 }
 0x62b   : > { %p2985_p8 = pneg %p2984_p7 }
 0x62c   : > { %p2991_p9 = por %p2990_p5, %p2989_p3 }
 0x62e   : > { %p2992_p12 = pnand %p2991_p9, %p2985_p8 }
 0x630   : > { %2995 = shalt.err (!%p2992_p12)
}
 0x631   : > { %2530 = dma.vmem_to_hbm [thread:$0]  (%p4317_p0), %s4243_s19, 16, %s4241_s23, %s1969_s12  }
 0x632 PF: > { %s4318_s26 = sld [smem:[#allocation15_spill]]  ;;  %s4319_s30 = sld [smem:[#allocation16_spill]] }
 0x633   : > { %p4321_p13 = scmp.ge.s32.totalorder %s3042_s16, 2 }
 0x638   : > { %s2010_s17 = sand.u32 1, %s4318_s26   ;;  %p4320_p2 = scmp.ne.s32.totalorder %s4319_s30, 0 }
 0x639   : > { %s2011_s20 = scalar_lea.sflag [#allocation4], %s2010_s17 }
 0x63a   : > { %p2545_p6 = pnand %p4321_p13, %p4320_p2 }
 0x63c   : > { %3021 = dma.done.wait (!%p2545_p6), %s2011_s20, 4096  }
 0x63d   : > { %3023 = vsyncadd (!%p2545_p6), %s2011_s20, 4294963200  ;;  %s2020_s13 = scalar_lea.sflag [#allocation10], %s2010_s17 }
 0x63e   : > { %3025 = dma.done.wait (!%p2545_p6), %s2020_s13, 16  }
 0x63f   : > { %3027 = vsyncadd (!%p2545_p6), %s2020_s13, 4294967280  ;;  %p28_p0 = scmp.ge.s32.totalorder %s3224_s28, 4   ;;  %s4322_s13 = smov %s3034_s14 }
 0x640   : > { %s4323_s14 = smov %s3038_s15  ;;  %s4324_s15 = smov %s3233_s11 }
 0x641   : > { %s4325_s16 = smov %s3224_s28  ;;  %30 = sbr.rel (!%p28_p0) target bundleno = 8 (0x8), region = 126 }
 0x648   :  { %2024 = vsyncpa [#allocation3], 1 }
 0x649   :  { %2026 = vsyncpa [#allocation3 + $0x1], 1 }
 0x64a   :  { %2027 = vsyncpa [#allocation6], 1 }
 0x64b   :  { %2028 = vsyncpa [#allocation4], 1 }
 0x64c   :  { %2030 = vsyncpa [#allocation4 + $0x1], 1 }
 0x64d   :  { %2031 = vsyncpa [#allocation10], 1 }
 0x64e   :  { %2033 = vsyncpa [#allocation10 + $0x1], 1 }

</bundles_post_ra>
